<compile_context>
chip_gen: v5e
topology: v5e:2x2
jax: 0.10.0
libtpu: 0.0.40
codegen_flags: <defaults>
</compile_context>

<pallas_src>
import functools

import jax
import jax.numpy as jnp
from jax.experimental import pallas as pl
from jax.experimental.pallas import tpu as pltpu


def _coeff_kernel(use_tanh, n_points,
                  src_ref, dst_ref,
                  w1_ref, b1_ref, w2_ref, b2_ref, w3_ref, b3_ref,
                  wf1a_ref, wf1b_ref, bf1_ref, wf2_ref, bf2_ref,
                  out_ref):
    """One grid step = TB batch elements. Cloud blocks are (TB*N, 3)."""

    def encode(x):                                    # x: (TB*N, 3)
        m = x.shape[0]
        tb = m // n_points
        # Layer 1 (Cin=3): three broadcast FMAs on the VPU (keeps the MXU
        # free of a depth-3 contraction).
        h = (x[:, 0:1] * w1_ref[0:1, :]
             + x[:, 1:2] * w1_ref[1:2, :]
             + x[:, 2:3] * w1_ref[2:3, :]
             + b1_ref[...])
        h = jnp.maximum(h, 0.0)
        h = jnp.dot(h, w2_ref[...], preferred_element_type=jnp.float32) + b2_ref[...]
        h = jnp.maximum(h, 0.0)
        h = jnp.dot(h, w3_ref[...], preferred_element_type=jnp.float32) + b3_ref[...]
        h = jnp.maximum(h, 0.0)
        feat = h.shape[1]
        # PointNet global max-pool over the point axis -> (TB, F)
        return jnp.max(h.reshape(tb, n_points, feat), axis=1)

    g_src = encode(src_ref[...])                      # (TB, F)
    g_dst = encode(dst_ref[...])                      # (TB, F)

    # concat([g_src, g_dst], -1) @ Wf1  ==  g_src @ Wf1[:F] + g_dst @ Wf1[F:]
    f1 = (jnp.dot(g_src, wf1a_ref[...], preferred_element_type=jnp.float32)
          + jnp.dot(g_dst, wf1b_ref[...], preferred_element_type=jnp.float32)
          + bf1_ref[...])
    f1 = jnp.maximum(f1, 0.0)

    coeff = jnp.dot(f1, wf2_ref[...], preferred_element_type=jnp.float32) + bf2_ref[...]
    if use_tanh:                                      # static python bool
        coeff = 2.0 * jnp.tanh(coeff)

    out_ref[...] = coeff                              # (TB, K_pad), lane-dense


def _pick_batch_tile(batch, n_points):
    """Batch tile: <= ~2048 stacked point rows per cloud per step, 8-aligned."""
    cap = max(1, 2048 // n_points)
    if batch <= cap:
        return batch          # block equals full batch dim -> always legal
    return max(8, (cap // 8) * 8)


def raw_coefficient_net_v1(pc_src, pc_dst, params, *, use_tanh=True,
                           batch_tile=None):
    """pc_src, pc_dst: (B, 3, N) float32 (PyTorch NCW). Returns (B, K)."""
    B, C, N = pc_src.shape
    assert C == 3 and N % 8 == 0
    (w1, b1, w2, b2, w3, b3, wf1, bf1, wf2, bf2) = params
    F = w3.shape[1]
    K = wf2.shape[1]

    tb = batch_tile if batch_tile is not None else _pick_batch_tile(B, N)
    b_pad = -(-B // tb) * tb
    k_pad = -(-K // 128) * 128

    # NCW -> channels-last stacked rows (B_pad*N, 3). Padded batch rows are
    # zeros and are sliced off the output.
    def prep(pc):
        x = jnp.transpose(pc, (0, 2, 1)).astype(jnp.float32)      # (B, N, 3)
        if b_pad != B:
            x = jnp.pad(x, ((0, b_pad - B), (0, 0), (0, 0)))
        return x.reshape(b_pad * N, C)

    src = prep(pc_src)
    dst = prep(pc_dst)

    wf1a, wf1b = wf1[:F], wf1[F:]                     # split the concat-matmul
    wf2_p = jnp.pad(wf2, ((0, 0), (0, k_pad - K)))    # lane-dense output head
    bf2_p = jnp.pad(bf2, ((0, 0), (0, k_pad - K)))

    full = lambda arr: pl.BlockSpec(arr.shape, lambda b: (0,) * arr.ndim)
    cloud_spec = pl.BlockSpec((tb * N, C), lambda b: (b, 0))

    out = pl.pallas_call(
        functools.partial(_coeff_kernel, use_tanh, N),
        out_shape=jax.ShapeDtypeStruct((b_pad, k_pad), jnp.float32),
        grid=(b_pad // tb,),
        in_specs=[cloud_spec, cloud_spec,
                  full(w1), full(b1), full(w2), full(b2), full(w3), full(b3),
                  full(wf1a), full(wf1b), full(bf1), full(wf2_p), full(bf2_p)],
        out_specs=pl.BlockSpec((tb, k_pad), lambda b: (b, 0)),
        compiler_params=pltpu.CompilerParams(
            dimension_semantics=("parallel",)),
    )(src, dst, w1, b1, w2, b2, w3, b3, wf1a, wf1b, bf1, wf2_p, bf2_p)

    return out[:B, :K]


def _init_params(key, *, h1=64, h2=64, feat=128, fc1=128, k=32):
    ks = jax.random.split(key, 10)
    def lin(kk, cin, cout):
        scale = 1.0 / jnp.sqrt(cin)
        return scale * jax.random.normal(kk, (cin, cout), jnp.float32)
    w1 = lin(ks[0], 3, h1);      b1 = 0.01 * jax.random.normal(ks[1], (1, h1), jnp.float32)
    w2 = lin(ks[2], h1, h2);     b2 = 0.01 * jax.random.normal(ks[3], (1, h2), jnp.float32)
    w3 = lin(ks[4], h2, feat);   b3 = 0.01 * jax.random.normal(ks[5], (1, feat), jnp.float32)
    wf1 = lin(ks[6], 2 * feat, fc1); bf1 = 0.01 * jax.random.normal(ks[7], (1, fc1), jnp.float32)
    wf2 = lin(ks[8], fc1, k);    bf2 = 0.01 * jax.random.normal(ks[9], (1, k), jnp.float32)
    return (w1, b1, w2, b2, w3, b3, wf1, bf1, wf2, bf2)


def _reference(pc_src, pc_dst, params, use_tanh):
    (w1, b1, w2, b2, w3, b3, wf1, bf1, wf2, bf2) = params

    def enc(pc):
        x = jnp.transpose(pc, (0, 2, 1))                          # (B, N, 3)
        # == x @ w1 + b1, written as FMAs to mirror the kernel's exact f32 path
        h = (x[..., 0:1] * w1[0] + x[..., 1:2] * w1[1]
             + x[..., 2:3] * w1[2] + b1)
        h = jax.nn.relu(h)
        h = jax.nn.relu(h @ w2 + b2)
        h = jax.nn.relu(h @ w3 + b3)
        return jnp.max(h, axis=1)                                 # (B, F)

    feat = jnp.concatenate([enc(pc_src), enc(pc_dst)], axis=-1)
    f1 = jax.nn.relu(feat @ wf1 + bf1)
    out = f1 @ wf2 + bf2
    return 2.0 * jnp.tanh(out) if use_tanh else out


if __name__ == "__main__":
    B, C, N = 2, 3, 128
    key = jax.random.PRNGKey(0)
    k_src, k_dst, k_par = jax.random.split(key, 3)
    pc_src = jax.random.normal(k_src, (B, C, N), jnp.float32)
    pc_dst = jax.random.normal(k_dst, (B, C, N), jnp.float32)
    params = _init_params(k_par)

    coeff = raw_coefficient_net_v1(pc_src, pc_dst, params, use_tanh=True)
    coeff = jax.block_until_ready(coeff)

    ref = _reference(pc_src, pc_dst, params, use_tanh=True)
    assert coeff.shape == (B, 32)
    assert jnp.allclose(coeff, ref, rtol=1e-4, atol=1e-4), "mismatch vs JAX reference"

    print("KERNEL_OK")
</pallas_src>

<mosaic_0001>
module attributes {stable_mosaic.version = 11 : i64} {
  func.func @_coeff_kernel(%arg0: i32, %arg1: memref<256x3xf32, #tpu.memory_space<vmem>>, %arg2: memref<256x3xf32, #tpu.memory_space<vmem>>, %arg3: memref<3x64xf32, #tpu.memory_space<vmem>>, %arg4: memref<1x64xf32, #tpu.memory_space<vmem>>, %arg5: memref<64x64xf32, #tpu.memory_space<vmem>>, %arg6: memref<1x64xf32, #tpu.memory_space<vmem>>, %arg7: memref<64x128xf32, #tpu.memory_space<vmem>>, %arg8: memref<1x128xf32, #tpu.memory_space<vmem>>, %arg9: memref<128x128xf32, #tpu.memory_space<vmem>>, %arg10: memref<128x128xf32, #tpu.memory_space<vmem>>, %arg11: memref<1x128xf32, #tpu.memory_space<vmem>>, %arg12: memref<128x128xf32, #tpu.memory_space<vmem>>, %arg13: memref<1x128xf32, #tpu.memory_space<vmem>>, %arg14: memref<2x128xf32, #tpu.memory_space<vmem>>) attributes {dimension_semantics = [#tpu.dimension_semantics<parallel>], iteration_bounds = array<i64: 1>, scalar_prefetch = 0 : i64, scratch_operands = 0 : i64, tpu.core_type = #tpu.core_type<tc>, window_params = [{transform_indices = @transform_0, window_bounds = array<i64: 256, 3>}, {transform_indices = @transform_1, window_bounds = array<i64: 256, 3>}, {pipeline_mode = #tpu.pipeline_mode<synchronous>, transform_indices = @transform_2, window_bounds = array<i64: 3, 64>}, {pipeline_mode = #tpu.pipeline_mode<synchronous>, transform_indices = @transform_3, window_bounds = array<i64: 1, 64>}, {pipeline_mode = #tpu.pipeline_mode<synchronous>, transform_indices = @transform_4, window_bounds = array<i64: 64, 64>}, {pipeline_mode = #tpu.pipeline_mode<synchronous>, transform_indices = @transform_5, window_bounds = array<i64: 1, 64>}, {pipeline_mode = #tpu.pipeline_mode<synchronous>, transform_indices = @transform_6, window_bounds = array<i64: 64, 128>}, {pipeline_mode = #tpu.pipeline_mode<synchronous>, transform_indices = @transform_7, window_bounds = array<i64: 1, 128>}, {pipeline_mode = #tpu.pipeline_mode<synchronous>, transform_indices = @transform_8, window_bounds = array<i64: 128, 128>}, {pipeline_mode = #tpu.pipeline_mode<synchronous>, transform_indices = @transform_9, window_bounds = array<i64: 128, 128>}, {pipeline_mode = #tpu.pipeline_mode<synchronous>, transform_indices = @transform_10, window_bounds = array<i64: 1, 128>}, {pipeline_mode = #tpu.pipeline_mode<synchronous>, transform_indices = @transform_11, window_bounds = array<i64: 128, 128>}, {pipeline_mode = #tpu.pipeline_mode<synchronous>, transform_indices = @transform_12, window_bounds = array<i64: 1, 128>}, {transform_indices = @transform_13, window_bounds = array<i64: 2, 128>}]} {
    %c0 = arith.constant 0 : index
    %c0_0 = arith.constant 0 : index
    %0 = vector.load %arg1[%c0, %c0_0] : memref<256x3xf32, #tpu.memory_space<vmem>>, vector<256x3xf32>
    %1 = vector.extract_strided_slice %0 {offsets = [0, 0], sizes = [256, 1], strides = [1, 1]} : vector<256x3xf32> to vector<256x1xf32>
    %c0_1 = arith.constant 0 : index
    %c0_2 = arith.constant 0 : index
    %2 = vector.load %arg3[%c0_1, %c0_2] : memref<3x64xf32, #tpu.memory_space<vmem>>, vector<1x64xf32>
    %3 = vector.broadcast %1 : vector<256x1xf32> to vector<256x64xf32>
    %4 = vector.broadcast %2 : vector<1x64xf32> to vector<256x64xf32>
    %5 = arith.mulf %3, %4 : vector<256x64xf32>
    %6 = vector.extract_strided_slice %0 {offsets = [0, 1], sizes = [256, 1], strides = [1, 1]} : vector<256x3xf32> to vector<256x1xf32>
    %c1 = arith.constant 1 : index
    %c0_3 = arith.constant 0 : index
    %7 = vector.load %arg3[%c1, %c0_3] : memref<3x64xf32, #tpu.memory_space<vmem>>, vector<1x64xf32>
    %8 = vector.broadcast %6 : vector<256x1xf32> to vector<256x64xf32>
    %9 = vector.broadcast %7 : vector<1x64xf32> to vector<256x64xf32>
    %10 = arith.mulf %8, %9 : vector<256x64xf32>
    %11 = arith.addf %5, %10 : vector<256x64xf32>
    %12 = vector.extract_strided_slice %0 {offsets = [0, 2], sizes = [256, 1], strides = [1, 1]} : vector<256x3xf32> to vector<256x1xf32>
    %c2 = arith.constant 2 : index
    %c0_4 = arith.constant 0 : index
    %13 = vector.load %arg3[%c2, %c0_4] : memref<3x64xf32, #tpu.memory_space<vmem>>, vector<1x64xf32>
    %14 = vector.broadcast %12 : vector<256x1xf32> to vector<256x64xf32>
    %15 = vector.broadcast %13 : vector<1x64xf32> to vector<256x64xf32>
    %16 = arith.mulf %14, %15 : vector<256x64xf32>
    %17 = arith.addf %11, %16 : vector<256x64xf32>
    %c0_5 = arith.constant 0 : index
    %c0_6 = arith.constant 0 : index
    %18 = vector.load %arg4[%c0_5, %c0_6] : memref<1x64xf32, #tpu.memory_space<vmem>>, vector<1x64xf32>
    %19 = vector.broadcast %18 : vector<1x64xf32> to vector<256x64xf32>
    %20 = arith.addf %17, %19 : vector<256x64xf32>
    %cst = arith.constant 0.000000e+00 : f32
    %21 = vector.broadcast %cst : f32 to vector<256x64xf32>
    %22 = arith.maximumf %20, %21 : vector<256x64xf32>
    %c0_7 = arith.constant 0 : index
    %c0_8 = arith.constant 0 : index
    %23 = vector.load %arg5[%c0_7, %c0_8] : memref<64x64xf32, #tpu.memory_space<vmem>>, vector<64x64xf32>
    %cst_9 = arith.constant dense<0.000000e+00> : vector<256x64xf32>
    %24 = tpu.matmul %22, %23, %cst_9 {dimension_numbers = #tpu.dot_dimension_numbers<[1], [0], [0], [1], [0, 0, 1, 1], [], []>} : vector<256x64xf32>, vector<64x64xf32>, vector<256x64xf32> -> vector<256x64xf32>
    %c0_10 = arith.constant 0 : index
    %c0_11 = arith.constant 0 : index
    %25 = vector.load %arg6[%c0_10, %c0_11] : memref<1x64xf32, #tpu.memory_space<vmem>>, vector<1x64xf32>
    %26 = vector.broadcast %25 : vector<1x64xf32> to vector<256x64xf32>
    %27 = arith.addf %24, %26 : vector<256x64xf32>
    %cst_12 = arith.constant 0.000000e+00 : f32
    %28 = vector.broadcast %cst_12 : f32 to vector<256x64xf32>
    %29 = arith.maximumf %27, %28 : vector<256x64xf32>
    %c0_13 = arith.constant 0 : index
    %c0_14 = arith.constant 0 : index
    %30 = vector.load %arg7[%c0_13, %c0_14] : memref<64x128xf32, #tpu.memory_space<vmem>>, vector<64x128xf32>
    %cst_15 = arith.constant dense<0.000000e+00> : vector<256x128xf32>
    %31 = tpu.matmul %29, %30, %cst_15 {dimension_numbers = #tpu.dot_dimension_numbers<[1], [0], [0], [1], [0, 0, 1, 1], [], []>} : vector<256x64xf32>, vector<64x128xf32>, vector<256x128xf32> -> vector<256x128xf32>
    %c0_16 = arith.constant 0 : index
    %c0_17 = arith.constant 0 : index
    %32 = vector.load %arg8[%c0_16, %c0_17] : memref<1x128xf32, #tpu.memory_space<vmem>>, vector<1x128xf32>
    %33 = vector.broadcast %32 : vector<1x128xf32> to vector<256x128xf32>
    %34 = arith.addf %31, %33 : vector<256x128xf32>
    %cst_18 = arith.constant 0.000000e+00 : f32
    %35 = vector.broadcast %cst_18 : f32 to vector<256x128xf32>
    %36 = arith.maximumf %34, %35 : vector<256x128xf32>
    %37 = vector.shape_cast %36 : vector<256x128xf32> to vector<2x128x128xf32>
    %cst_19 = arith.constant dense<0xFF800000> : vector<2x128xf32>
    %38 = vector.multi_reduction <maximumf>, %37, %cst_19 [1] : vector<2x128x128xf32> to vector<2x128xf32>
    %c0_20 = arith.constant 0 : index
    %c0_21 = arith.constant 0 : index
    %39 = vector.load %arg2[%c0_20, %c0_21] : memref<256x3xf32, #tpu.memory_space<vmem>>, vector<256x3xf32>
    %40 = vector.extract_strided_slice %39 {offsets = [0, 0], sizes = [256, 1], strides = [1, 1]} : vector<256x3xf32> to vector<256x1xf32>
    %c0_22 = arith.constant 0 : index
    %c0_23 = arith.constant 0 : index
    %41 = vector.load %arg3[%c0_22, %c0_23] : memref<3x64xf32, #tpu.memory_space<vmem>>, vector<1x64xf32>
    %42 = vector.broadcast %40 : vector<256x1xf32> to vector<256x64xf32>
    %43 = vector.broadcast %41 : vector<1x64xf32> to vector<256x64xf32>
    %44 = arith.mulf %42, %43 : vector<256x64xf32>
    %45 = vector.extract_strided_slice %39 {offsets = [0, 1], sizes = [256, 1], strides = [1, 1]} : vector<256x3xf32> to vector<256x1xf32>
    %c1_24 = arith.constant 1 : index
    %c0_25 = arith.constant 0 : index
    %46 = vector.load %arg3[%c1_24, %c0_25] : memref<3x64xf32, #tpu.memory_space<vmem>>, vector<1x64xf32>
    %47 = vector.broadcast %45 : vector<256x1xf32> to vector<256x64xf32>
    %48 = vector.broadcast %46 : vector<1x64xf32> to vector<256x64xf32>
    %49 = arith.mulf %47, %48 : vector<256x64xf32>
    %50 = arith.addf %44, %49 : vector<256x64xf32>
    %51 = vector.extract_strided_slice %39 {offsets = [0, 2], sizes = [256, 1], strides = [1, 1]} : vector<256x3xf32> to vector<256x1xf32>
    %c2_26 = arith.constant 2 : index
    %c0_27 = arith.constant 0 : index
    %52 = vector.load %arg3[%c2_26, %c0_27] : memref<3x64xf32, #tpu.memory_space<vmem>>, vector<1x64xf32>
    %53 = vector.broadcast %51 : vector<256x1xf32> to vector<256x64xf32>
    %54 = vector.broadcast %52 : vector<1x64xf32> to vector<256x64xf32>
    %55 = arith.mulf %53, %54 : vector<256x64xf32>
    %56 = arith.addf %50, %55 : vector<256x64xf32>
    %c0_28 = arith.constant 0 : index
    %c0_29 = arith.constant 0 : index
    %57 = vector.load %arg4[%c0_28, %c0_29] : memref<1x64xf32, #tpu.memory_space<vmem>>, vector<1x64xf32>
    %58 = vector.broadcast %57 : vector<1x64xf32> to vector<256x64xf32>
    %59 = arith.addf %56, %58 : vector<256x64xf32>
    %cst_30 = arith.constant 0.000000e+00 : f32
    %60 = vector.broadcast %cst_30 : f32 to vector<256x64xf32>
    %61 = arith.maximumf %59, %60 : vector<256x64xf32>
    %c0_31 = arith.constant 0 : index
    %c0_32 = arith.constant 0 : index
    %62 = vector.load %arg5[%c0_31, %c0_32] : memref<64x64xf32, #tpu.memory_space<vmem>>, vector<64x64xf32>
    %cst_33 = arith.constant dense<0.000000e+00> : vector<256x64xf32>
    %63 = tpu.matmul %61, %62, %cst_33 {dimension_numbers = #tpu.dot_dimension_numbers<[1], [0], [0], [1], [0, 0, 1, 1], [], []>} : vector<256x64xf32>, vector<64x64xf32>, vector<256x64xf32> -> vector<256x64xf32>
    %c0_34 = arith.constant 0 : index
    %c0_35 = arith.constant 0 : index
    %64 = vector.load %arg6[%c0_34, %c0_35] : memref<1x64xf32, #tpu.memory_space<vmem>>, vector<1x64xf32>
    %65 = vector.broadcast %64 : vector<1x64xf32> to vector<256x64xf32>
    %66 = arith.addf %63, %65 : vector<256x64xf32>
    %cst_36 = arith.constant 0.000000e+00 : f32
    %67 = vector.broadcast %cst_36 : f32 to vector<256x64xf32>
    %68 = arith.maximumf %66, %67 : vector<256x64xf32>
    %c0_37 = arith.constant 0 : index
    %c0_38 = arith.constant 0 : index
    %69 = vector.load %arg7[%c0_37, %c0_38] : memref<64x128xf32, #tpu.memory_space<vmem>>, vector<64x128xf32>
    %cst_39 = arith.constant dense<0.000000e+00> : vector<256x128xf32>
    %70 = tpu.matmul %68, %69, %cst_39 {dimension_numbers = #tpu.dot_dimension_numbers<[1], [0], [0], [1], [0, 0, 1, 1], [], []>} : vector<256x64xf32>, vector<64x128xf32>, vector<256x128xf32> -> vector<256x128xf32>
    %c0_40 = arith.constant 0 : index
    %c0_41 = arith.constant 0 : index
    %71 = vector.load %arg8[%c0_40, %c0_41] : memref<1x128xf32, #tpu.memory_space<vmem>>, vector<1x128xf32>
    %72 = vector.broadcast %71 : vector<1x128xf32> to vector<256x128xf32>
    %73 = arith.addf %70, %72 : vector<256x128xf32>
    %cst_42 = arith.constant 0.000000e+00 : f32
    %74 = vector.broadcast %cst_42 : f32 to vector<256x128xf32>
    %75 = arith.maximumf %73, %74 : vector<256x128xf32>
    %76 = vector.shape_cast %75 : vector<256x128xf32> to vector<2x128x128xf32>
    %cst_43 = arith.constant dense<0xFF800000> : vector<2x128xf32>
    %77 = vector.multi_reduction <maximumf>, %76, %cst_43 [1] : vector<2x128x128xf32> to vector<2x128xf32>
    %c0_44 = arith.constant 0 : index
    %c0_45 = arith.constant 0 : index
    %78 = vector.load %arg9[%c0_44, %c0_45] : memref<128x128xf32, #tpu.memory_space<vmem>>, vector<128x128xf32>
    %cst_46 = arith.constant dense<0.000000e+00> : vector<2x128xf32>
    %79 = tpu.matmul %38, %78, %cst_46 {dimension_numbers = #tpu.dot_dimension_numbers<[1], [0], [0], [1], [0, 0, 1, 1], [], []>} : vector<2x128xf32>, vector<128x128xf32>, vector<2x128xf32> -> vector<2x128xf32>
    %c0_47 = arith.constant 0 : index
    %c0_48 = arith.constant 0 : index
    %80 = vector.load %arg10[%c0_47, %c0_48] : memref<128x128xf32, #tpu.memory_space<vmem>>, vector<128x128xf32>
    %cst_49 = arith.constant dense<0.000000e+00> : vector<2x128xf32>
    %81 = tpu.matmul %77, %80, %cst_49 {dimension_numbers = #tpu.dot_dimension_numbers<[1], [0], [0], [1], [0, 0, 1, 1], [], []>} : vector<2x128xf32>, vector<128x128xf32>, vector<2x128xf32> -> vector<2x128xf32>
    %82 = arith.addf %79, %81 : vector<2x128xf32>
    %c0_50 = arith.constant 0 : index
    %c0_51 = arith.constant 0 : index
    %83 = vector.load %arg11[%c0_50, %c0_51] : memref<1x128xf32, #tpu.memory_space<vmem>>, vector<1x128xf32>
    %84 = vector.broadcast %83 : vector<1x128xf32> to vector<2x128xf32>
    %85 = arith.addf %82, %84 : vector<2x128xf32>
    %cst_52 = arith.constant 0.000000e+00 : f32
    %86 = vector.broadcast %cst_52 : f32 to vector<2x128xf32>
    %87 = arith.maximumf %85, %86 : vector<2x128xf32>
    %c0_53 = arith.constant 0 : index
    %c0_54 = arith.constant 0 : index
    %88 = vector.load %arg12[%c0_53, %c0_54] : memref<128x128xf32, #tpu.memory_space<vmem>>, vector<128x128xf32>
    %cst_55 = arith.constant dense<0.000000e+00> : vector<2x128xf32>
    %89 = tpu.matmul %87, %88, %cst_55 {dimension_numbers = #tpu.dot_dimension_numbers<[1], [0], [0], [1], [0, 0, 1, 1], [], []>} : vector<2x128xf32>, vector<128x128xf32>, vector<2x128xf32> -> vector<2x128xf32>
    %c0_56 = arith.constant 0 : index
    %c0_57 = arith.constant 0 : index
    %90 = vector.load %arg13[%c0_56, %c0_57] : memref<1x128xf32, #tpu.memory_space<vmem>>, vector<1x128xf32>
    %91 = vector.broadcast %90 : vector<1x128xf32> to vector<2x128xf32>
    %92 = arith.addf %89, %91 : vector<2x128xf32>
    %93 = math.tanh %92 : vector<2x128xf32>
    %cst_58 = arith.constant 2.000000e+00 : f32
    %94 = vector.broadcast %cst_58 : f32 to vector<2x128xf32>
    %95 = arith.mulf %94, %93 : vector<2x128xf32>
    %c0_59 = arith.constant 0 : index
    %c0_60 = arith.constant 0 : index
    %96 = vector.load %arg14[%c0_59, %c0_60] : memref<2x128xf32, #tpu.memory_space<vmem>>, vector<2x128xf32>
    tpu.vector_store %arg14[%c0_59, %c0_60], %95 {strides = array<i32>} : memref<2x128xf32, #tpu.memory_space<vmem>>, vector<2x128xf32>,
    return
  }
  func.func @transform_0(%arg0: i32) -> (i32, i32) {
    %c0_i32 = arith.constant 0 : i32
    %c0_i32_0 = arith.constant 0 : i32
    return %arg0, %c0_i32 : i32, i32
  }
  func.func @transform_1(%arg0: i32) -> (i32, i32) {
    %c0_i32 = arith.constant 0 : i32
    %c0_i32_0 = arith.constant 0 : i32
    return %arg0, %c0_i32 : i32, i32
  }
  func.func @transform_2(%arg0: i32) -> (i32, i32) {
    %c0_i32 = arith.constant 0 : i32
    %c0_i32_0 = arith.constant 0 : i32
    %c0_i32_1 = arith.constant 0 : i32
    return %c0_i32, %c0_i32_0 : i32, i32
  }
  func.func @transform_3(%arg0: i32) -> (i32, i32) {
    %c0_i32 = arith.constant 0 : i32
    %c0_i32_0 = arith.constant 0 : i32
    %c0_i32_1 = arith.constant 0 : i32
    return %c0_i32, %c0_i32_0 : i32, i32
  }
  func.func @transform_4(%arg0: i32) -> (i32, i32) {
    %c0_i32 = arith.constant 0 : i32
    %c0_i32_0 = arith.constant 0 : i32
    %c0_i32_1 = arith.constant 0 : i32
    return %c0_i32, %c0_i32_0 : i32, i32
  }
  func.func @transform_5(%arg0: i32) -> (i32, i32) {
    %c0_i32 = arith.constant 0 : i32
    %c0_i32_0 = arith.constant 0 : i32
    %c0_i32_1 = arith.constant 0 : i32
    return %c0_i32, %c0_i32_0 : i32, i32
  }
  func.func @transform_6(%arg0: i32) -> (i32, i32) {
    %c0_i32 = arith.constant 0 : i32
    %c0_i32_0 = arith.constant 0 : i32
    %c0_i32_1 = arith.constant 0 : i32
    return %c0_i32, %c0_i32_0 : i32, i32
  }
  func.func @transform_7(%arg0: i32) -> (i32, i32) {
    %c0_i32 = arith.constant 0 : i32
    %c0_i32_0 = arith.constant 0 : i32
    %c0_i32_1 = arith.constant 0 : i32
    return %c0_i32, %c0_i32_0 : i32, i32
  }
  func.func @transform_8(%arg0: i32) -> (i32, i32) {
    %c0_i32 = arith.constant 0 : i32
    %c0_i32_0 = arith.constant 0 : i32
    %c0_i32_1 = arith.constant 0 : i32
    return %c0_i32, %c0_i32_0 : i32, i32
  }
  func.func @transform_9(%arg0: i32) -> (i32, i32) {
    %c0_i32 = arith.constant 0 : i32
    %c0_i32_0 = arith.constant 0 : i32
    %c0_i32_1 = arith.constant 0 : i32
    return %c0_i32, %c0_i32_0 : i32, i32
  }
  func.func @transform_10(%arg0: i32) -> (i32, i32) {
    %c0_i32 = arith.constant 0 : i32
    %c0_i32_0 = arith.constant 0 : i32
    %c0_i32_1 = arith.constant 0 : i32
    return %c0_i32, %c0_i32_0 : i32, i32
  }
  func.func @transform_11(%arg0: i32) -> (i32, i32) {
    %c0_i32 = arith.constant 0 : i32
    %c0_i32_0 = arith.constant 0 : i32
    %c0_i32_1 = arith.constant 0 : i32
    return %c0_i32, %c0_i32_0 : i32, i32
  }
  func.func @transform_12(%arg0: i32) -> (i32, i32) {
    %c0_i32 = arith.constant 0 : i32
    %c0_i32_0 = arith.constant 0 : i32
    %c0_i32_1 = arith.constant 0 : i32
    return %c0_i32, %c0_i32_0 : i32, i32
  }
  func.func @transform_13(%arg0: i32) -> (i32, i32) {
    %c0_i32 = arith.constant 0 : i32
    %c0_i32_0 = arith.constant 0 : i32
    return %arg0, %c0_i32 : i32, i32
  }
}

</mosaic_0001>

<bundles_post_ra>
// kernel: tpu_custom_call.1
= control target key start
LH: loop header
LB: loop body
LE: loop exit
PB: predicated region body
PF: predicated region fallthrough
CT: control target
= control target key end

     0   :  { %v4604_v3 = vmov 0   ;;  %s4590_s0 = inlined_call_operand.vmem [shape: f32[256,3], index: 0, kind: input, shape index: {}]   ;;  %s4591_s1 = inlined_call_operand.vmem [shape: f32[256,3], index: 1, kind: input, shape index: {}]   ;;  %s4592_s2 = inlined_call_operand.vmem [shape: f32[3,64], index: 2, kind: input, shape index: {}]   ;;  %s4593_s3 = inlined_call_operand.vmem [shape: f32[1,64], index: 3, kind: input, shape index: {}]   ;;  %s4594_s4 = inlined_call_operand.vmem [shape: f32[64,64], index: 4, kind: input, shape index: {}]   ;;  %s4595_s5 = inlined_call_operand.vmem [shape: f32[1,64], index: 5, kind: input, shape index: {}]   ;;  %s4596_s6 = inlined_call_operand.vmem [shape: f32[64,128], index: 6, kind: input, shape index: {}]   ;;  %s4597_s7 = inlined_call_operand.vmem [shape: f32[1,128], index: 7, kind: input, shape index: {}]   ;;  %s4598_s8 = inlined_call_operand.vmem [shape: f32[128,128], index: 8, kind: input, shape index: {}]   ;;  %s4599_s9 = inlined_call_operand.vmem [shape: f32[128,128], index: 9, kind: input, shape index: {}]   ;;  %s4600_s10 = inlined_call_operand.vmem [shape: f32[1,128], index: 10, kind: input, shape index: {}]   ;;  %s4601_s11 = inlined_call_operand.vmem [shape: f32[128,128], index: 11, kind: input, shape index: {}]   ;;  %s4602_s12 = inlined_call_operand.vmem [shape: f32[1,128], index: 12, kind: input, shape index: {}]   ;;  %s4603_s13 = inlined_call_operand.hbm [shape: f32[2,128], index: 13, kind: output, shape index: {}]  }
   0x1   :  { %v2976_v0 = vld [vmem:[%s4590_s0 + $0x20] sm:$0xff]  ;;  %v2981_v1 = vld [vmem:[%s4590_s0 + $0x10] sm:$0xff]  ;;  %2752 = vset.pattern.permute.xlu2 %v4604_v3  ;;  %2751 = vset.pattern.permute.xlu1 %v4604_v3  ;;  %v2997_v4 = vld [vmem:[%s4590_s0 + $0x28] sm:$0xff] }
   0x2   :  { %v2986_v2 = vld [vmem:[%s4590_s0] sm:$0xff]  ;;  %2750 = vset.pattern.permute.xlu0 %v4604_v3  ;;  %100 = vperm.xlu2 %2752, %v2976_v0   ;;  %v3002_v5 = vld [vmem:[%s4590_s0 + $0x18] sm:$0xff]  ;;  %v3007_v6 = vld [vmem:[%s4590_s0 + $0x8] sm:$0xff] }
   0x3   :  { %90 = vperm.xlu1 %2751, %v2981_v1   ;;  %80 = vperm.xlu0 %2750, %v2986_v2  }
   0x4   :  { %18 = vsyncpa [#allocation3], 0  ;;  %v3015_v7 = vld [vmem:[%s4590_s0 + $0x40] sm:$0xff]  ;;  %v3020_v8 = vld [vmem:[%s4590_s0 + $0x38] sm:$0xff]  ;;  %v4606_v33 = vmov 1   ;;  %v4608_v49 = vmov 2  }
   0x5   :  { %v3025_v9 = vld [vmem:[%s4590_s0 + $0x30] sm:$0xff]  ;;  %v3033_v10 = vld [vmem:[%s4590_s0 + $0x58] sm:$0xff]  ;;  %v3043_v12 = vld [vmem:[%s4590_s0 + $0x48] sm:$0xff]  ;;  %vm739_vm0 = vcmask 523264   ;;  %vm2506_vm1 = vcmask 1041409   ;;  %s2902_s27 = smov [#allocation2]  }
   0x6   :  { %v3038_v11 = vld [vmem:[%s4590_s0 + $0x50] sm:$0xff]  ;;  %v3056_v14 = vld [vmem:[%s4590_s0 + $0x68] sm:$0xff]  ;;  %v3061_v15 = vld [vmem:[%s4590_s0 + $0x60] sm:$0xff]  ;;  %s2607_s28 = sshll.u32 %s2902_s27, 4  ;;  %s2609_s14 = sshll.u32 %s4603_s13, 4  ;;  %s2608_s28 = int_to_ptr.vmem [resolvable:$true] %s2607_s28  ;;  %s2610_s14 = int_to_ptr.hbm [resolvable:$true] %s2609_s14 }
   0x7   :  { %v3051_v13 = vld [vmem:[%s4590_s0 + $0x70] sm:$0xff]  ;;  %v62_v16 = vld [vmem:[%s4590_s0 + $0x88] sm:$0xff]  ;;  %v3072_v17 = vld [vmem:[%s4590_s0 + $0x80] sm:$0xff] }
   0x8   :  { %v3077_v18 = vld [vmem:[%s4590_s0 + $0x78] sm:$0xff]  ;;  %v3084_v19 = vld [vmem:[%s4590_s0 + $0xa0] sm:$0xff]  ;;  %v63_v21 = vld [vmem:[%s4590_s0 + $0x90] sm:$0xff] }
   0x9   :  { %v3089_v20 = vld [vmem:[%s4590_s0 + $0x98] sm:$0xff]  ;;  %v3102_v23 = vld [vmem:[%s4590_s0 + $0xb0] sm:$0xff]  ;;  %v3107_v24 = vld [vmem:[%s4590_s0 + $0xa8] sm:$0xff] }
   0xa   :  { %105 = vperm.xlu2 %2752, %v2997_v4   ;;  %v68_v22 = vld [vmem:[%s4590_s0 + $0xb8] sm:$0xff]  ;;  %v3114_v25 = vld [vmem:[%s4590_s0 + $0xd0] sm:$0xff]  ;;  %v3119_v26 = vld [vmem:[%s4590_s0 + $0xc8] sm:$0xff] }
   0xb   :  { %95 = vperm.xlu1 %2751, %v3002_v5   ;;  %85 = vperm.xlu0 %2750, %v3007_v6   ;;  %v69_v27 = vld [vmem:[%s4590_s0 + $0xc0] sm:$0xff]  ;;  %v74_v28 = vld [vmem:[%s4590_s0 + $0xe8] sm:$0xff]  ;;  %v72_v30 = vld [vmem:[%s4590_s0 + $0xd8] sm:$0xff] }
   0xc   :  { %v73_v29 = vld [vmem:[%s4590_s0 + $0xe0] sm:$0xff]  ;;  %v76_v31 = vld [vmem:[%s4590_s0 + $0xf8] sm:$0xff]  ;;  %v75_v32 = vld [vmem:[%s4590_s0 + $0xf0] sm:$0xff] }
   0xd   :  { %v1278_v34 = vld [vmem:[%s4591_s1 + $0x10] sm:$0xff]  ;;  %v1276_v44 = vld [vmem:[%s4591_s1] sm:$0xff]  ;;  %v1277_v48 = vld [vmem:[%s4591_s1 + $0x8] sm:$0xff] }
   0xe   :  { %v1279_v56 = vld [vmem:[%s4591_s1 + $0x18] sm:$0xff] }
   0xf   :  { %v3223_v60 = vld [vmem:[%s4591_s1 + $0x38] sm:$0xff] }
  0x12   :  { %120 = vperm.xlu2 %2752, %v3015_v7  }
  0x13   :  { %115 = vperm.xlu1 %2751, %v3020_v8   ;;  %110 = vperm.xlu0 %2750, %v3025_v9  }
  0x1a   :  { %135 = vperm.xlu2 %2752, %v3033_v10  }
  0x1b   :  { %130 = vperm.xlu1 %2751, %v3038_v11   ;;  %125 = vperm.xlu0 %2750, %v3043_v12  }
  0x22   :  { %150 = vperm.xlu2 %2752, %v3051_v13  }
  0x23   :  { %145 = vperm.xlu1 %2751, %v3056_v14   ;;  %140 = vperm.xlu0 %2750, %v3061_v15  }
  0x2a   :  { %165 = vperm.xlu2 %2752, %v62_v16  }
  0x2b   :  { %160 = vperm.xlu1 %2751, %v3072_v17   ;;  %155 = vperm.xlu0 %2750, %v3077_v18  }
  0x32   :  { %180 = vperm.xlu2 %2752, %v3084_v19  }
  0x33   :  { %175 = vperm.xlu1 %2751, %v3089_v20   ;;  %170 = vperm.xlu0 %2750, %v63_v21  }
  0x3a   :  { %195 = vperm.xlu2 %2752, %v68_v22  }
  0x3b   :  { %190 = vperm.xlu1 %2751, %v3102_v23   ;;  %185 = vperm.xlu0 %2750, %v3107_v24  }
  0x42   :  { %210 = vperm.xlu2 %2752, %v3114_v25  }
  0x43   :  { %205 = vperm.xlu1 %2751, %v3119_v26   ;;  %200 = vperm.xlu0 %2750, %v69_v27  }
  0x4a   :  { %225 = vperm.xlu2 %2752, %v74_v28  }
  0x4b   :  { %220 = vperm.xlu1 %2751, %v73_v29   ;;  %215 = vperm.xlu0 %2750, %v72_v30   ;;  %v1280_v29 = vld [vmem:[%s4591_s1 + $0x20] sm:$0xff] }
  0x52   :  { %2753 = vset.pattern.permute.xlu2 %v4606_v33 }
  0x53   :  { %235 = vperm.xlu1 %2751, %v76_v31   ;;  %230 = vperm.xlu0 %2750, %v75_v32  }
  0x54   :  { %273 = vperm.xlu2 %2753, %v2986_v2  }
  0x5b   :  { %2754 = vset.pattern.permute.xlu1 %v4606_v33  ;;  %1320 = vperm.xlu0 %2750, %v1278_v34  }
  0x5c   :  { %281 = vperm.xlu1 %2754, %v2981_v1   ;;  %285 = vperm.xlu2 %2753, %v3002_v5   ;;  %v3149_v35 = vpop.permute.xlu2 %100 }
  0x63   :  { %2758 = vset.pattern.permute.xlu0 %v4606_v33 }
  0x64   :  { %289 = vperm.xlu1 %2754, %v2976_v0   ;;  %293 = vperm.xlu2 %2753, %v2997_v4   ;;  %v3154_v36 = vpop.permute.xlu2 %105 }
  0x65   :  { %277 = vperm.xlu0 %2758, %v3007_v6  }
  0x6c   :  { %301 = vperm.xlu1 %2754, %v3020_v8   ;;  %305 = vperm.xlu2 %2753, %v3015_v7   ;;  %v3159_v37 = vpop.permute.xlu2 %120 }
  0x6d   :  { %297 = vperm.xlu0 %2758, %v3025_v9  }
  0x74   :  { %313 = vperm.xlu1 %2754, %v3038_v11   ;;  %317 = vperm.xlu2 %2753, %v3033_v10   ;;  %v3164_v38 = vpop.permute.xlu2 %135 }
  0x75   :  { %309 = vperm.xlu0 %2758, %v3043_v12   ;;  %v3167_v39 = vpop.permute.xlu1 %90  ;;  %v3169_v40 = vpop.permute.xlu0 %80 }
  0x7c   :  { %325 = vperm.xlu1 %2754, %v3056_v14   ;;  %329 = vperm.xlu2 %2753, %v3051_v13   ;;  %v3173_v41 = vpop.permute.xlu2 %150 }
  0x7d   :  { %4610 = vst [vmem:[#allocation5_spill] sm:$0xff] %v3173_v41  ;;  %321 = vperm.xlu0 %2758, %v3061_v15   ;;  %v3176_v42 = vpop.permute.xlu1 %95  ;;  %v3178_v43 = vpop.permute.xlu0 %85 }
  0x84   :  { %337 = vperm.xlu1 %2754, %v3072_v17   ;;  %2755 = vset.pattern.permute.xlu2 %v4604_v3  ;;  %v3185_v45 = vpop.permute.xlu2 %165 }
  0x85   :  { %4611 = vst [vmem:[#allocation6_spill] sm:$0xff] %v3185_v45  ;;  %333 = vperm.xlu0 %2758, %v3077_v18   ;;  %v3188_v46 = vpop.permute.xlu1 %115  ;;  %1310 = vperm.xlu2 %2755, %v1276_v44   ;;  %v3190_v47 = vpop.permute.xlu0 %110 }
  0x8c   :  { %2756 = vset.pattern.permute.xlu1 %v4608_v49  ;;  %v3196_v50 = vpop.permute.xlu2 %180 }
  0x8d   :  { %4612 = vst [vmem:[#allocation7_spill] sm:$0xff] %v3196_v50  ;;  %1501 = vperm.xlu0 %2758, %v1276_v44   ;;  %1693 = vperm.xlu1 %2756, %v1276_v44   ;;  %v3198_v51 = vpop.permute.xlu1 %130  ;;  %v3200_v52 = vpop.permute.xlu0 %125 }
  0x8e   :  { %1315 = vperm.xlu2 %2755, %v1277_v48  }
  0x94   :  { %v3202_v53 = vpop.permute.xlu2 %195 }
  0x95   :  { %4613 = vst [vmem:[#allocation8_spill] sm:$0xff] %v3202_v53  ;;  %1505 = vperm.xlu0 %2758, %v1277_v48   ;;  %1697 = vperm.xlu1 %2756, %v1277_v48   ;;  %v3204_v54 = vpop.permute.xlu1 %145  ;;  %v3206_v55 = vpop.permute.xlu0 %140  ;;  %v3357_v53 = vld [vmem:[%s4591_s1 + $0x60] sm:$0xff] }
  0x96   :  { %4614 = vst [vmem:[#allocation9_spill] sm:$0xff] %v3204_v54  ;;  %2757 = vset.pattern.permute.xlu2 %v4608_v49 }
  0x97   :  { %467 = vperm.xlu2 %2757, %v2986_v2   ;;  %v3238_v2 = vld [vmem:[%s4591_s1 + $0x58] sm:$0xff] }
  0x9c   :  { %v3213_v57 = vpop.permute.xlu2 %210 }
  0x9d   :  { %4615 = vst [vmem:[#allocation10_spill] sm:$0xff] %v3213_v57  ;;  %1513 = vperm.xlu0 %2758, %v1279_v56   ;;  %2759 = vset.pattern.permute.xlu1 %v4606_v33  ;;  %v3216_v58 = vpop.permute.xlu1 %160  ;;  %v3218_v59 = vpop.permute.xlu0 %155 }
  0x9e   :  { %4616 = vst [vmem:[#allocation11_spill] sm:$0xff] %v3216_v58  ;;  %1509 = vperm.xlu1 %2759, %v1278_v34  }
  0x9f   :  { %1701 = vperm.xlu2 %2757, %v1278_v34   ;;  %v1281_v34 = vld [vmem:[%s4591_s1 + $0x28] sm:$0xff] }
  0xa4   :  { %v3225_v61 = vpop.permute.xlu2 %225 }
  0xa5   :  { %4617 = vst [vmem:[#allocation12_spill] sm:$0xff] %v3225_v61  ;;  %1529 = vperm.xlu0 %2758, %v3223_v60   ;;  %v3228_v62 = vpop.permute.xlu1 %175  ;;  %v3230_v63 = vpop.permute.xlu0 %170  ;;  %v1284_v61 = vld [vmem:[%s4591_s1 + $0x40] sm:$0xff] }
  0xa6   :  { %4618 = vst [vmem:[#allocation13_spill] sm:$0xff] %v3228_v62  ;;  %2760 = vset.pattern.permute.xlu1 %v4608_v49 }
  0xa7   :  { %4619 = vst [vmem:[#allocation14_spill] sm:$0xff] %v3230_v63  ;;  %2761 = vset.pattern.permute.xlu2 %v4604_v3  ;;  %471 = vperm.xlu1 %2760, %v3007_v6   ;;  %v3252_v6 = vld [vmem:[%s4591_s1 + $0x78] sm:$0xff]  ;;  %v3382_v63 = vld [vmem:[%s4592_s2 + $0x2] ss:$0 sm:$0xff] }
  0xa8   :  { %1325 = vperm.xlu2 %2761, %v1279_v56  }
  0xad   :  { %1545 = vperm.xlu0 %2758, %v3238_v2   ;;  %v3241_v16 = vpop.permute.xlu1 %190  ;;  %v3243_v21 = vpop.permute.xlu0 %185 }
  0xae   :  { %4620 = vst [vmem:[#allocation15_spill] sm:$0xff] %v3241_v16  ;;  %v3245_v22 = vpop.permute.xlu2 %273  ;;  %v3367_v16 = vld [vmem:[%s4592_s2 + $0x1] ss:$0 sm:$0xff] }
  0xaf   :  { %4621 = vst [vmem:[#allocation16_spill] sm:$0xff] %v3243_v21  ;;  %1705 = vperm.xlu1 %2760, %v1279_v56   ;;  %v401_v21 = vmul.f32 %v3367_v16, %v3245_v22 }
  0xb0   :  { %2762 = vset.pattern.permute.xlu2 %v4608_v49 }
  0xb1   :  { %475 = vperm.xlu2 %2762, %v2981_v1  }
  0xb5   :  { %1561 = vperm.xlu0 %2758, %v3252_v6   ;;  %v3255_v27 = vpop.permute.xlu1 %205  ;;  %v3257_v28 = vpop.permute.xlu0 %200 }
  0xb6   :  { %4622 = vst [vmem:[#allocation17_spill] sm:$0xff] %v3255_v27  ;;  %v3262_v30 = vpop.permute.xlu2 %285  ;;  %v727_v27 = vld [vmem:[%s4594_s4] sm:$0xff] }
  0xb7   :  { %4623 = vst [vmem:[#allocation18_spill] sm:$0xff] %v3257_v28  ;;  %2763 = vset.pattern.permute.xlu1 %v4604_v3 }
  0xb8   :  { %1330 = vperm.xlu1 %2763, %v1280_v29  }
  0xb9   :  { %2764 = vset.pattern.permute.xlu2 %v4606_v33 }
  0xba   :  { %1517 = vperm.xlu2 %2764, %v1280_v29  }
  0xbd   :  { %2795 = vset.pattern.permute.xlu0 %v4608_v49  ;;  %v3267_v1 = vpop.permute.xlu1 %220  ;;  %v3269_v31 = vpop.permute.xlu0 %215 }
  0xbe   :  { %4624 = vst [vmem:[#allocation19_spill] sm:$0xff] %v3267_v1  ;;  %1709 = vperm.xlu0 %2795, %v1280_v29   ;;  %v3271_v32 = vpop.permute.xlu2 %293  ;;  %v734_v29 = vld [vmem:[%s4594_s4 + $0x38] sm:$0xff] }
  0xbf   :  { %4625 = vst [vmem:[#allocation20_spill] sm:$0xff] %v3269_v31  ;;  %844 = vmatpush.msra.mxu0 %v734_v29  ;;  %2052 = vmatpush.msra.mxu2 %v734_v29  ;;  %v730_v29 = vld [vmem:[%s4594_s4 + $0x18] sm:$0xff] }
  0xc0   :  { %2765 = vset.pattern.permute.xlu1 %v4608_v49 }
  0xc1   :  { %479 = vperm.xlu1 %2765, %v3002_v5   ;;  %v733_v5 = vld [vmem:[%s4594_s4 + $0x30] sm:$0xff] }
  0xc2   :  { %2766 = vset.pattern.permute.xlu2 %v4604_v3  ;;  %v1282_v3 = vld [vmem:[%s4591_s1 + $0x30] sm:$0xff]  ;;  %845 = vmatpush.msra.mxu0 %v733_v5 }
  0xc3   :  { %1335 = vperm.xlu2 %2766, %v1281_v34   ;;  %2053 = vmatpush.msra.mxu2 %v733_v5  ;;  %v4629_v5 = vmov 1  }
  0xc5   :  { %v3279_v44 = vpop.permute.xlu1 %235  ;;  %v3281_v48 = vpop.permute.xlu0 %230 }
  0xc6   :  { %4626 = vst [vmem:[#allocation21_spill] sm:$0xff] %v3279_v44  ;;  %483 = vperm.xlu0 %2795, %v2976_v0   ;;  %v3284_v56 = vpop.permute.xlu2 %305 }
  0xc7   :  { %4627 = vst [vmem:[#allocation22_spill] sm:$0xff] %v3281_v48  ;;  %v732_v48 = vld [vmem:[%s4594_s4 + $0x28] sm:$0xff] }
  0xc8   :  { %846 = vmatpush.msra.mxu0 %v732_v48  ;;  %2054 = vmatpush.msra.mxu2 %v732_v48  ;;  %v729_v48 = vld [vmem:[%s4594_s4 + $0x10] sm:$0xff] }
  0xc9   :  { %2767 = vset.pattern.permute.xlu1 %v4606_v33 }
  0xca   :  { %1521 = vperm.xlu1 %2767, %v1281_v34  }
  0xcb   :  { %2768 = vset.pattern.permute.xlu2 %v4608_v49  ;;  %v731_v49 = vld [vmem:[%s4594_s4 + $0x20] sm:$0xff] }
  0xcc   :  { %1713 = vperm.xlu2 %2768, %v1281_v34   ;;  %847 = vmatpush.msra.mxu0 %v731_v49  ;;  %v4628_v34 = vmov 0  }
  0xcd   :  { %v3297_v0 = vpop.permute.xlu0 %1320  ;;  %2055 = vmatpush.msra.mxu2 %v731_v49  ;;  %v728_v49 = vld [vmem:[%s4594_s4 + $0x8] sm:$0xff] }
  0xce   :  { %1717 = vperm.xlu0 %2795, %v1282_v3   ;;  %v3299_v33 = vpop.permute.xlu1 %281  ;;  %v3301_v44 = vpop.permute.xlu2 %317  ;;  %848 = vmatpush.msra.mxu0 %v730_v29 }
  0xcf   :  { %2056 = vmatpush.msra.mxu2 %v730_v29 }
  0xd0   :  { %849 = vmatpush.msra.mxu0 %v729_v48 }
  0xd1   :  { %2057 = vmatpush.msra.mxu2 %v729_v48 }
  0xd2   :  { %2769 = vset.pattern.permute.xlu1 %v4628_v34  ;;  %850 = vmatpush.msra.mxu0 %v728_v49 }
  0xd3   :  { %1340 = vperm.xlu1 %2769, %v1282_v3   ;;  %2058 = vmatpush.msra.mxu2 %v728_v49  ;;  %v3344_v49 = vld [vmem:[%s4591_s1 + $0x50] sm:$0xff] }
  0xd4   :  { %2770 = vset.pattern.permute.xlu2 %v4629_v5  ;;  %851 = vmatpush.msra.mxu0 %v727_v27 }
  0xd5   :  { %1525 = vperm.xlu2 %2770, %v1282_v3   ;;  %2059 = vmatpush.msra.mxu2 %v727_v27  ;;  %v4631_v3 = vmov 2  }
  0xd6   :  { %1725 = vperm.xlu0 %2795, %v1284_v61   ;;  %v3320_v1 = vpop.permute.xlu1 %289  ;;  %v3325_v31 = vpop.permute.xlu2 %329 }
  0xd7   :  { %4630 = vst [vmem:[#allocation23_spill] sm:$0xff] %v3325_v31  ;;  %v3327_v57 = vpop.permute.xlu0 %277  ;;  %v3392_v31 = vld [vmem:[%s4593_s3] ss:$0 sm:$0xff] }
  0xdb   :  { %2771 = vset.pattern.permute.xlu1 %v4631_v3 }
  0xdc   :  { %487 = vperm.xlu1 %2771, %v2997_v4  }
  0xdd   :  { %2772 = vset.pattern.permute.xlu2 %v4628_v34 }
  0xde   :  { %1345 = vperm.xlu2 %2772, %v3223_v60   ;;  %499 = vperm.xlu0 %2795, %v3015_v7   ;;  %v3337_v29 = vpop.permute.xlu1 %301 }
  0xdf   :  { %v3339_v48 = vpop.permute.xlu0 %297  ;;  %v1311_v28 = vpop.permute.xlu2 %1310 }
  0xe4   :  { %1721 = vperm.xlu1 %2771, %v3223_v60   ;;  %v3362_v60 = vld [vmem:[%s4592_s2] ss:$0 sm:$0xff] }
  0xe5   :  { %v251_v50 = vmul.f32 %v3362_v60, %v3206_v55 }
  0xe6   :  { %2773 = vset.pattern.permute.xlu2 %v4631_v3  ;;  %1733 = vperm.xlu0 %2795, %v3344_v49   ;;  %v3349_v4 = vpop.permute.xlu1 %313 }
  0xe7   :  { %491 = vperm.xlu2 %2773, %v3025_v9   ;;  %v3352_v7 = vpop.permute.xlu0 %309  ;;  %v239_v9 = vmul.f32 %v3362_v60, %v3169_v40 }
  0xe8   :  { %v1316_v27 = vpop.permute.xlu2 %1315 }
  0xe9   :  { %v433_v55 = vadd.f32 %v401_v21, %v239_v9 }
  0xec   :  { %2774 = vset.pattern.permute.xlu1 %v4628_v34 }
  0xed   :  { %1350 = vperm.xlu1 %2774, %v1284_v61  }
  0xee   :  { %1741 = vperm.xlu0 %2795, %v3357_v53   ;;  %v3377_v62 = vpop.permute.xlu1 %325 }
  0xef   :  { %4632 = vst [vmem:[#allocation24_spill] sm:$0xff] %v3377_v62  ;;  %2775 = vset.pattern.permute.xlu2 %v4629_v5  ;;  %v322_v45 = vpop.permute.xlu0 %321  ;;  %v254_v62 = vmul.f32 %v3362_v60, %v3218_v59 }
  0xf0   :  { %v413_v40 = vmul.f32 %v3367_v16, %v322_v45  ;;  %1533 = vperm.xlu2 %2775, %v1284_v61  }
  0xf1   :  { %v468_v58 = vpop.permute.xlu2 %467 }
  0xf2   :  { %v3386_v41 = vadd.f32 %v413_v40, %v251_v50  ;;  %v595_v22 = vmul.f32 %v3382_v63, %v468_v58  ;;  %v1285_v50 = vld [vmem:[%s4591_s1 + $0x48] sm:$0xff] }
  0xf4   :  { %v627_v54 = vadd.f32 %v595_v22, %v433_v55  ;;  %v1468_v55 = vmul.f32 %v3362_v60, %v1311_v28 }
  0xf5   :  { %2776 = vset.pattern.permute.xlu1 %v4631_v3 }
  0xf6   :  { %515 = vperm.xlu0 %2795, %v3061_v15   ;;  %v3398_v45 = vpop.permute.xlu1 %337  ;;  %495 = vperm.xlu1 %2776, %v3020_v8   ;;  %v663_v58 = vadd.f32 %v3392_v31, %v627_v54  ;;  %v3413_v8 = vld [vmem:[%s4591_s1 + $0x70] sm:$0xff] }
  0xf7   :  { %4633 = vst [vmem:[#allocation25_spill] sm:$0xff] %v3398_v45  ;;  %v334_v61 = vpop.permute.xlu0 %333 }
  0xf8   :  { %v416_v21 = vmul.f32 %v3367_v16, %v334_v61  ;;  %2777 = vset.pattern.permute.xlu2 %v4628_v34  ;;  %v695_v9 = vmax.f32 %v663_v58, 0.0 }
  0xf9   :  { %1355 = vperm.xlu2 %2777, %v1285_v50   ;;  %v1702_v59 = vpop.permute.xlu2 %1701 }
  0xfa   :  { %v3407_v15 = vadd.f32 %v416_v21, %v254_v62  ;;  %2618 = vmatmul.msk.f32.vlgmr.msra.gmra.mxu0 %vm739_vm0, %v695_v9  ;;  %v3424_v21 = vld [vmem:[%s4591_s1 + $0x80] sm:$0xff] }
  0xfc   :  { %4634 = vst [vmem:[#allocation26_spill] sm:$0xff] %v3407_v15 }
  0xfe   :  { %1749 = vperm.xlu0 %2795, %v3413_v8   ;;  %2778 = vset.pattern.permute.xlu1 %v4629_v5 }
  0xff   :  { %v1502_v54 = vpop.permute.xlu0 %1501  ;;  %v1694_v40 = vpop.permute.xlu1 %1693  ;;  %1537 = vperm.xlu1 %2778, %v1285_v50  }
 0x100   :  { %v1628_v22 = vmul.f32 %v3367_v16, %v1502_v54  ;;  %v1820_v62 = vmul.f32 %v3382_v63, %v1694_v40  ;;  %v1469_v54 = vmul.f32 %v3362_v60, %v1316_v27 }
 0x101   :  { %2779 = vset.pattern.permute.xlu2 %v4631_v3 }
 0x102   :  { %v1660_v58 = vadd.f32 %v1628_v22, %v1468_v55  ;;  %1729 = vperm.xlu2 %2779, %v1285_v50   ;;  %v1326_v61 = vpop.permute.xlu2 %1325 }
 0x104   :  { %v1852_v9 = vadd.f32 %v1820_v62, %v1660_v58 }
 0x106   :  { %1757 = vperm.xlu0 %2795, %v3424_v21   ;;  %v1884_v15 = vadd.f32 %v3392_v31, %v1852_v9 }
 0x107   :  { %v1506_v28 = vpop.permute.xlu0 %1505  ;;  %v1698_v45 = vpop.permute.xlu1 %1697  ;;  %2780 = vset.pattern.permute.xlu1 %v4628_v34 }
 0x108   :  { %v1629_v40 = vmul.f32 %v3367_v16, %v1506_v28  ;;  %v1821_v50 = vmul.f32 %v3382_v63, %v1698_v45  ;;  %1360 = vperm.xlu1 %2780, %v3344_v49   ;;  %v1916_v55 = vmax.f32 %v1884_v15, 0.0  ;;  %v1470_v15 = vmul.f32 %v3362_v60, %v3297_v0 }
 0x10a   :  { %v1661_v22 = vadd.f32 %v1629_v40, %v1469_v54  ;;  %2781 = vset.pattern.permute.xlu2 %v4629_v5  ;;  %2682 = vmatmul.msk.f32.vlgmr.msra.gmra.mxu2 %vm739_vm0, %v1916_v55  ;;  %v240_v55 = vmul.f32 %v3362_v60, %v3178_v43  ;;  %v241_v43 = vmul.f32 %v3362_v60, %v3167_v39 }
 0x10b   :  { %1541 = vperm.xlu2 %2781, %v3344_v49   ;;  %v476_v58 = vpop.permute.xlu2 %475  ;;  %v1822_v49 = vmul.f32 %v3382_v63, %v1702_v59 }
 0x10c   :  { %v1853_v62 = vadd.f32 %v1821_v50, %v1661_v22 }
 0x10e   :  { %531 = vperm.xlu0 %2795, %v3072_v17   ;;  %v1885_v27 = vadd.f32 %v3392_v31, %v1853_v62  ;;  %v3449_v17 = vld [vmem:[%s4591_s1 + $0x90] sm:$0xff] }
 0x10f   :  { %v1514_v9 = vpop.permute.xlu0 %1513 }
 0x110   :  { %v1510_v28 = vpop.permute.xlu1 %1509  ;;  %2782 = vset.pattern.permute.xlu1 %v4631_v3  ;;  %v1917_v45 = vmax.f32 %v1885_v27, 0.0 }
 0x111   :  { %v1630_v54 = vmul.f32 %v3367_v16, %v1510_v28  ;;  %503 = vperm.xlu1 %2782, %v3043_v12   ;;  %v402_v12 = vmul.f32 %v3367_v16, %v3327_v57  ;;  %v403_v28 = vmul.f32 %v3367_v16, %v3299_v33  ;;  %v597_v57 = vmul.f32 %v3382_v63, %v476_v58 }
 0x112   :  { %2683 = vmatmul.msk.f32.gmra.mxu2 %vm739_vm0, %v1917_v45  ;;  %v1471_v33 = vmul.f32 %v3362_v60, %v1326_v61 }
 0x113   :  { %v1662_v40 = vadd.f32 %v1630_v54, %v1470_v15  ;;  %2783 = vset.pattern.permute.xlu2 %v4628_v34  ;;  %v434_v45 = vadd.f32 %v402_v12, %v240_v55 }
 0x114   :  { %1365 = vperm.xlu2 %2783, %v3238_v2   ;;  %v1518_v50 = vpop.permute.xlu2 %1517 }
 0x115   :  { %v1854_v0 = vadd.f32 %v1822_v49, %v1662_v40  ;;  %v435_v49 = vadd.f32 %v403_v28, %v241_v43  ;;  %v1631_v40 = vmul.f32 %v3367_v16, %v1514_v9  ;;  %v1632_v43 = vmul.f32 %v3367_v16, %v1518_v50 }
 0x116   :  { %1765 = vperm.xlu0 %2795, %v3449_v17  }
 0x117   :  { %v3457_v59 = vpop.permute.xlu0 %1529  ;;  %v1886_v22 = vadd.f32 %v3392_v31, %v1854_v0  ;;  %v629_v39 = vadd.f32 %v597_v57, %v435_v49 }
 0x119   :  { %1737 = vperm.xlu1 %2782, %v3238_v2   ;;  %v472_v62 = vpop.permute.xlu1 %471  ;;  %v1918_v27 = vmax.f32 %v1886_v22, 0.0  ;;  %v1663_v22 = vadd.f32 %v1631_v40, %v1471_v33  ;;  %v665_v9 = vadd.f32 %v3392_v31, %v629_v39 }
 0x11a   :  { %v596_v15 = vmul.f32 %v3382_v63, %v472_v62 }
 0x11b   :  { %2684 = vmatmul.msk.f32.gmra.mxu2 %vm739_vm0, %v1918_v27  ;;  %v697_v28 = vmax.f32 %v665_v9, 0.0 }
 0x11c   :  { %v628_v54 = vadd.f32 %v596_v15, %v434_v45  ;;  %2784 = vset.pattern.permute.xlu2 %v4631_v3 }
 0x11d   :  { %507 = vperm.xlu2 %2784, %v3038_v11   ;;  %v3470_v2 = vpop.permute.xlu2 %1335 }
 0x11e   :  { %551 = vperm.xlu0 %2795, %v3107_v24   ;;  %v664_v0 = vadd.f32 %v3392_v31, %v628_v54 }
 0x11f   :  { %v3476_v55 = vpop.permute.xlu0 %1545 }
 0x120   :  { %v696_v58 = vmax.f32 %v664_v0, 0.0  ;;  %v242_v0 = vmul.f32 %v3362_v60, %v3176_v42  ;;  %v243_v42 = vmul.f32 %v3362_v60, %v3149_v35 }
 0x121   :  { %2785 = vset.pattern.permute.xlu1 %v4628_v34  ;;  %v1706_v12 = vpop.permute.xlu1 %1705 }
 0x122   :  { %v1823_v11 = vmul.f32 %v3382_v63, %v1706_v12  ;;  %1370 = vperm.xlu1 %2785, %v3357_v53   ;;  %2619 = vmatmul.msk.f32.gmra.mxu0 %vm739_vm0, %v696_v58 }
 0x124   :  { %v1855_v61 = vadd.f32 %v1823_v11, %v1663_v22  ;;  %v3515_v22 = vld [vmem:[%s4591_s1 + $0x98] sm:$0xff] }
 0x125   :  { %2786 = vset.pattern.permute.xlu2 %v4629_v5 }
 0x126   :  { %1549 = vperm.xlu2 %2786, %v3357_v53   ;;  %555 = vperm.xlu0 %2795, %v3102_v23   ;;  %v1714_v24 = vpop.permute.xlu2 %1713  ;;  %v1887_v62 = vadd.f32 %v3392_v31, %v1855_v61  ;;  %v3496_v23 = vld [vmem:[%s4591_s1 + $0xc0] sm:$0xff]  ;;  %v1289_v53 = vld [vmem:[%s4591_s1 + $0x68] sm:$0xff] }
 0x127   :  { %v3487_v27 = vpop.permute.xlu0 %1561 }
 0x128   :  { %v1919_v45 = vmax.f32 %v1887_v62, 0.0 }
 0x12a   :  { %2787 = vset.pattern.permute.xlu1 %v4631_v3  ;;  %v1331_v15 = vpop.permute.xlu1 %1330  ;;  %2620 = vmatmul.msk.f32.gmra.mxu0 %vm739_vm0, %v697_v28 }
 0x12b   :  { %2685 = vmatmul.msk.f32.gmra.mxu2 %vm739_vm0, %v1919_v45  ;;  %511 = vperm.xlu1 %2787, %v3033_v10   ;;  %v1472_v57 = vmul.f32 %v3362_v60, %v1331_v15  ;;  %v404_v10 = vmul.f32 %v3367_v16, %v3262_v30  ;;  %v405_v30 = vmul.f32 %v3367_v16, %v3320_v1 }
 0x12d   :  { %v1664_v33 = vadd.f32 %v1632_v43, %v1472_v57  ;;  %v436_v58 = vadd.f32 %v404_v10, %v242_v0  ;;  %v437_v1 = vadd.f32 %v405_v30, %v243_v42  ;;  %v1473_v10 = vmul.f32 %v3362_v60, %v3470_v2 }
 0x12e   :  { %2788 = vset.pattern.permute.xlu2 %v4628_v34  ;;  %1789 = vperm.xlu0 %2795, %v3496_v23  }
 0x12f   :  { %1375 = vperm.xlu2 %2788, %v1289_v53   ;;  %v1526_v54 = vpop.permute.xlu2 %1525 }
 0x130   :  { %v1710_v49 = vpop.permute.xlu0 %1709 }
 0x131   :  { %v1824_v40 = vmul.f32 %v3382_v63, %v1710_v49  ;;  %v1825_v49 = vmul.f32 %v3382_v63, %v1714_v24  ;;  %v1634_v24 = vmul.f32 %v3367_v16, %v1526_v54 }
 0x133   :  { %v1856_v39 = vadd.f32 %v1824_v40, %v1664_v33  ;;  %2789 = vset.pattern.permute.xlu1 %v4629_v5  ;;  %v480_v50 = vpop.permute.xlu1 %479 }
 0x134   :  { %v598_v12 = vmul.f32 %v3382_v63, %v480_v50  ;;  %1553 = vperm.xlu1 %2789, %v1289_v53  }
 0x135   :  { %v1888_v11 = vadd.f32 %v3392_v31, %v1856_v39 }
 0x136   :  { %v630_v61 = vadd.f32 %v598_v12, %v436_v58  ;;  %2817 = vset.pattern.permute.xlu0 %v4628_v34  ;;  %v3552_v12 = vld [vmem:[%s4591_s1 + $0xc8] sm:$0xff] }
 0x137   :  { %2790 = vset.pattern.permute.xlu2 %v4631_v3  ;;  %1405 = vperm.xlu0 %2817, %v3515_v22   ;;  %v1920_v9 = vmax.f32 %v1888_v11, 0.0 }
 0x138   :  { %1745 = vperm.xlu2 %2790, %v1289_v53   ;;  %v484_v62 = vpop.permute.xlu0 %483  ;;  %v3525_v28 = vpop.permute.xlu2 %1345  ;;  %v666_v45 = vadd.f32 %v3392_v31, %v630_v61  ;;  %v3535_v53 = vld [vmem:[%s4591_s1 + $0xa0] sm:$0xff] }
 0x139   :  { %v599_v15 = vmul.f32 %v3382_v63, %v484_v62  ;;  %2686 = vmatmul.msk.f32.gmra.mxu2 %vm739_vm0, %v1920_v9 }
 0x13a   :  { %v698_v43 = vmax.f32 %v666_v45, 0.0  ;;  %v406_v45 = vmul.f32 %v3367_v16, %v3271_v32 }
 0x13b   :  { %v631_v57 = vadd.f32 %v599_v15, %v437_v1  ;;  %v988_v1 = vld [vmem:[%s4596_s6 + $0x38] sm:$0xff] }
 0x13c   :  { %2791 = vset.pattern.permute.xlu1 %v4628_v34  ;;  %v1522_v35 = vpop.permute.xlu1 %1521  ;;  %2621 = vmatmul.msk.f32.gmra.mxu0 %vm739_vm0, %v698_v43  ;;  %v244_v43 = vmul.f32 %v3362_v60, %v3154_v36  ;;  %v407_v36 = vmul.f32 %v3367_v16, %v3339_v48  ;;  %v1635_v48 = vmul.f32 %v3367_v16, %v3457_v59 }
 0x13d   :  { %v1633_v33 = vmul.f32 %v3367_v16, %v1522_v35  ;;  %1380 = vperm.xlu1 %2791, %v3413_v8   ;;  %v667_v40 = vadd.f32 %v3392_v31, %v631_v57  ;;  %1097 = vmatpush.msra.mxu1 %v988_v1  ;;  %v987_v35 = vld [vmem:[%s4596_s6 + $0x30] sm:$0xff] }
 0x13e   :  { %2293 = vmatpush.msra.mxu3 %v988_v1 }
 0x13f   :  { %v1665_v0 = vadd.f32 %v1633_v33, %v1473_v10  ;;  %1410 = vperm.xlu0 %2817, %v3535_v53   ;;  %v699_v58 = vmax.f32 %v667_v40, 0.0  ;;  %v438_v10 = vadd.f32 %v406_v45, %v244_v43  ;;  %1098 = vmatpush.msra.mxu1 %v987_v35  ;;  %v245_v33 = vmul.f32 %v3362_v60, %v3190_v47  ;;  %v985_v47 = vld [vmem:[%s4596_s6 + $0x20] sm:$0xff] }
 0x140   :  { %2792 = vset.pattern.permute.xlu2 %v4629_v5  ;;  %v1718_v30 = vpop.permute.xlu0 %1717  ;;  %2294 = vmatpush.msra.mxu3 %v987_v35 }
 0x141   :  { %v1857_v39 = vadd.f32 %v1825_v49, %v1665_v0  ;;  %1557 = vperm.xlu2 %2792, %v3413_v8   ;;  %v492_v50 = vpop.permute.xlu2 %491  ;;  %v1826_v8 = vmul.f32 %v3382_v63, %v1718_v30 }
 0x142   :  { %v601_v0 = vmul.f32 %v3382_v63, %v492_v50  ;;  %v439_v50 = vadd.f32 %v407_v36, %v245_v33  ;;  %v408_v33 = vmul.f32 %v3367_v16, %v3337_v29  ;;  %v409_v29 = vmul.f32 %v3367_v16, %v3284_v56 }
 0x143   :  { %v1889_v2 = vadd.f32 %v3392_v31, %v1857_v39  ;;  %v1475_v39 = vmul.f32 %v3362_v60, %v3525_v28 }
 0x144   :  { %2622 = vmatmul.msk.f32.gmra.mxu0 %vm739_vm0, %v699_v58 }
 0x145   :  { %2793 = vset.pattern.permute.xlu1 %v4631_v3  ;;  %v1341_v11 = vpop.permute.xlu1 %1340  ;;  %v1921_v61 = vmax.f32 %v1889_v2, 0.0  ;;  %v1667_v28 = vadd.f32 %v1635_v48, %v1475_v39 }
 0x146   :  { %v1474_v42 = vmul.f32 %v3362_v60, %v1341_v11  ;;  %519 = vperm.xlu1 %2793, %v3056_v14   ;;  %v3572_v14 = vld [vmem:[%s4591_s1 + $0xd0] sm:$0xff]  ;;  %v633_v11 = vadd.f32 %v601_v0, %v439_v50 }
 0x147   :  { %1435 = vperm.xlu0 %2817, %v3552_v12   ;;  %2687 = vmatmul.msk.f32.gmra.mxu2 %vm739_vm0, %v1921_v61 }
 0x148   :  { %v1666_v54 = vadd.f32 %v1634_v24, %v1474_v42  ;;  %v984_v24 = vld [vmem:[%s4596_s6 + $0x18] sm:$0xff] }
 0x149   :  { %2794 = vset.pattern.permute.xlu2 %v4628_v34 }
 0x14a   :  { %v1858_v9 = vadd.f32 %v1826_v8, %v1666_v54  ;;  %1385 = vperm.xlu2 %2794, %v3252_v6   ;;  %v3562_v62 = vpop.permute.xlu2 %1533  ;;  %v982_v8 = vld [vmem:[%s4596_s6 + $0x8] sm:$0xff]  ;;  %v669_v54 = vadd.f32 %v3392_v31, %v633_v11 }
 0x14b   :  { %v1636_v43 = vmul.f32 %v3367_v16, %v3562_v62  ;;  %v1293_v62 = vld [vmem:[%s4591_s1 + $0x88] sm:$0xff] }
 0x14c   :  { %v1890_v15 = vadd.f32 %v3392_v31, %v1858_v9  ;;  %v981_v9 = vld [vmem:[%s4596_s6] sm:$0xff] }
 0x14e   :  { %1753 = vperm.xlu1 %2793, %v3252_v6   ;;  %v488_v57 = vpop.permute.xlu1 %487  ;;  %v1922_v32 = vmax.f32 %v1890_v15, 0.0  ;;  %v986_v6 = vld [vmem:[%s4596_s6 + $0x28] sm:$0xff]  ;;  %v1726_v15 = vpop.permute.xlu0 %1725 }
 0x14f   :  { %v600_v49 = vmul.f32 %v3382_v63, %v488_v57  ;;  %1440 = vperm.xlu0 %2817, %v3572_v14   ;;  %1099 = vmatpush.msra.mxu1 %v986_v6  ;;  %v701_v57 = vmax.f32 %v669_v54, 0.0  ;;  %v1828_v35 = vmul.f32 %v3382_v63, %v1726_v15 }
 0x150   :  { %2688 = vmatmul.msk.f32.gmra.mxu2 %vm739_vm0, %v1922_v32  ;;  %2295 = vmatpush.msra.mxu3 %v986_v6  ;;  %v246_v6 = vmul.f32 %v3362_v60, %v3188_v46 }
 0x151   :  { %v632_v40 = vadd.f32 %v600_v49, %v438_v10  ;;  %1100 = vmatpush.msra.mxu1 %v985_v47 }
 0x152   :  { %2796 = vset.pattern.permute.xlu2 %v4631_v3  ;;  %2296 = vmatpush.msra.mxu3 %v985_v47  ;;  %v440_v48 = vadd.f32 %v408_v33, %v246_v6  ;;  %v248_v33 = vmul.f32 %v3362_v60, %v3200_v52  ;;  %v249_v52 = vmul.f32 %v3362_v60, %v3198_v51  ;;  %v3718_v51 = vld [vmem:[%s4590_s0 + $0xd8] sm:$0xff] }
 0x153   :  { %523 = vperm.xlu2 %2796, %v3051_v13   ;;  %v3601_v58 = vpop.permute.xlu2 %1355  ;;  %v668_v2 = vadd.f32 %v3392_v31, %v632_v40  ;;  %1101 = vmatpush.msra.mxu1 %v984_v24  ;;  %v983_v13 = vld [vmem:[%s4596_s6 + $0x10] sm:$0xff] }
 0x154   :  { %2297 = vmatpush.msra.mxu3 %v984_v24 }
 0x155   :  { %v700_v30 = vmax.f32 %v668_v2, 0.0  ;;  %1102 = vmatpush.msra.mxu1 %v983_v13  ;;  %v247_v2 = vmul.f32 %v3362_v60, %v3159_v37  ;;  %v1477_v37 = vmul.f32 %v3362_v60, %v3601_v58 }
 0x156   :  { %2797 = vset.pattern.permute.xlu1 %v4628_v34  ;;  %v1722_v59 = vpop.permute.xlu1 %1721  ;;  %2298 = vmatpush.msra.mxu3 %v983_v13  ;;  %v500_v40 = vpop.permute.xlu0 %499 }
 0x157   :  { %v1827_v61 = vmul.f32 %v3382_v63, %v1722_v59  ;;  %2820 = vset.pattern.permute.xlu0 %v4629_v5  ;;  %1390 = vperm.xlu1 %2797, %v3424_v21   ;;  %v603_v46 = vmul.f32 %v3382_v63, %v500_v40  ;;  %v441_v24 = vadd.f32 %v409_v29, %v247_v2 }
 0x158   :  { %349 = vperm.xlu0 %2820, %v3089_v20   ;;  %2623 = vmatmul.msk.f32.gmra.mxu0 %vm739_vm0, %v700_v30  ;;  %v411_v40 = vmul.f32 %v3367_v16, %v3349_v4 }
 0x159   :  { %v1859_v42 = vadd.f32 %v1827_v61, %v1667_v28  ;;  %1103 = vmatpush.msra.mxu1 %v982_v8  ;;  %2299 = vmatpush.msra.mxu3 %v982_v8  ;;  %v635_v11 = vadd.f32 %v603_v46, %v441_v24  ;;  %v1639_v46 = vmul.f32 %v3367_v16, %v3476_v55 }
 0x15a   :  { %v443_v2 = vadd.f32 %v411_v40, %v249_v52  ;;  %v1297_v52 = vld [vmem:[%s4591_s1 + $0xa8] sm:$0xff] }
 0x15b   :  { %2798 = vset.pattern.permute.xlu2 %v4629_v5  ;;  %v1891_v45 = vadd.f32 %v3392_v31, %v1859_v42  ;;  %1104 = vmatpush.msra.mxu1 %v981_v9  ;;  %v671_v8 = vadd.f32 %v3392_v31, %v635_v11 }
 0x15c   :  { %1565 = vperm.xlu2 %2798, %v3424_v21   ;;  %v1730_v20 = vpop.permute.xlu2 %1729  ;;  %2300 = vmatpush.msra.mxu3 %v981_v9 }
 0x15d   :  { %v1923_v1 = vmax.f32 %v1891_v45, 0.0  ;;  %v1829_v28 = vmul.f32 %v3382_v63, %v1730_v20  ;;  %v703_v9 = vmax.f32 %v671_v8, 0.0 }
 0x15f   :  { %2799 = vset.pattern.permute.xlu1 %v4631_v3  ;;  %v1351_v32 = vpop.permute.xlu1 %1350  ;;  %2689 = vmatmul.msk.f32.gmra.mxu2 %vm739_vm0, %v1923_v1 }
 0x160   :  { %v1476_v10 = vmul.f32 %v3362_v60, %v1351_v32  ;;  %353 = vperm.xlu0 %2820, %v3084_v19   ;;  %2624 = vmatmul.msk.f32.gmra.mxu0 %vm739_vm0, %v701_v57  ;;  %v3644_v19 = vld [vmem:[%s4591_s1 + $0xb0] sm:$0xff] }
 0x161   :  { %527 = vperm.xlu1 %2799, %v3077_v18  }
 0x162   :  { %v1668_v21 = vadd.f32 %v1636_v43, %v1476_v10  ;;  %v1734_v43 = vpop.permute.xlu0 %1733 }
 0x163   :  { %v1830_v10 = vmul.f32 %v3382_v63, %v1734_v43 }
 0x164   :  { %v1860_v49 = vadd.f32 %v1828_v35, %v1668_v21  ;;  %2800 = vset.pattern.permute.xlu2 %v4628_v34 }
 0x165   :  { %1395 = vperm.xlu2 %2800, %v1293_v62   ;;  %v1542_v36 = vpop.permute.xlu2 %1541 }
 0x166   :  { %v1892_v18 = vadd.f32 %v3392_v31, %v1860_v49  ;;  %v1638_v15 = vmul.f32 %v3367_v16, %v1542_v36  ;;  %v410_v36 = vmul.f32 %v3367_v16, %v3352_v7 }
 0x168   :  { %1589 = vperm.xlu0 %2820, %v3644_v19   ;;  %v496_v0 = vpop.permute.xlu1 %495  ;;  %v1924_v47 = vmax.f32 %v1892_v18, 0.0  ;;  %v442_v29 = vadd.f32 %v410_v36, %v248_v33  ;;  %v412_v33 = vmul.f32 %v3367_v16, %v3301_v44 }
 0x169   :  { %2801 = vset.pattern.permute.xlu1 %v4629_v5  ;;  %v602_v39 = vmul.f32 %v3382_v63, %v496_v0 }
 0x16a   :  { %1569 = vperm.xlu1 %2801, %v1293_v62   ;;  %2690 = vmatmul.msk.f32.gmra.mxu2 %vm739_vm0, %v1924_v47  ;;  %v1742_v24 = vpop.permute.xlu0 %1741 }
 0x16b   :  { %v634_v50 = vadd.f32 %v602_v39, %v440_v48 }
 0x16d   :  { %2802 = vset.pattern.permute.xlu2 %v4631_v3  ;;  %v670_v30 = vadd.f32 %v3392_v31, %v634_v50 }
 0x16e   :  { %1761 = vperm.xlu2 %2802, %v1293_v62   ;;  %v1366_v56 = vpop.permute.xlu2 %1365  ;;  %v3692_v62 = vld [vmem:[%s4591_s1 + $0xe0] sm:$0xff] }
 0x16f   :  { %v702_v59 = vmax.f32 %v670_v30, 0.0  ;;  %v1479_v4 = vmul.f32 %v3362_v60, %v1366_v56 }
 0x170   :  { %373 = vperm.xlu0 %2820, %v3119_v26   ;;  %v3672_v26 = vld [vmem:[%s4595_s5] ss:$0 sm:$0xff] }
 0x171   :  { %v1538_v13 = vpop.permute.xlu1 %1537  ;;  %2625 = vmatmul.msk.f32.gmra.mxu0 %vm739_vm0, %v702_v59  ;;  %v1671_v56 = vadd.f32 %v1639_v46, %v1479_v4 }
 0x172   :  { %2803 = vset.pattern.permute.xlu1 %v4628_v34  ;;  %v1637_v61 = vmul.f32 %v3367_v16, %v1538_v13 }
 0x173   :  { %1400 = vperm.xlu1 %2803, %v3449_v17  }
 0x174   :  { %v1669_v42 = vadd.f32 %v1637_v61, %v1477_v37 }
 0x176   :  { %v1861_v54 = vadd.f32 %v1829_v28, %v1669_v42  ;;  %2804 = vset.pattern.permute.xlu2 %v4629_v5 }
 0x177   :  { %1573 = vperm.xlu2 %2804, %v3449_v17   ;;  %v853_v58 = vpop.f32.mrf.mxu0  ;;  %v508_v45 = vpop.permute.xlu2 %507 }
 0x178   :  { %v854_v20 = vadd.f32 %v3672_v26, %v853_v58  ;;  %377 = vperm.xlu0 %2820, %v3114_v25   ;;  %v1893_v1 = vadd.f32 %v3392_v31, %v1861_v54  ;;  %v2848_v25 = vld [vmem:[%s4590_s0 + $0x88] sm:$0xff]  ;;  %v605_v7 = vmul.f32 %v3382_v63, %v508_v45  ;;  %v3734_v58 = vld [vmem:[%s4590_s0 + $0xe0] sm:$0xff] }
 0x179   :  { %2626 = vmatmul.msk.f32.gmra.mxu0 %vm739_vm0, %v703_v9 }
 0x17a   :  { %v949_v57 = vmax.f32 %v854_v20, 0.0  ;;  %v1361_v32 = vpop.permute.xlu1 %1360  ;;  %v1925_v35 = vmax.f32 %v1893_v1, 0.0  ;;  %v637_v11 = vadd.f32 %v605_v7, %v443_v2  ;;  %v516_v1 = vpop.permute.xlu0 %515 }
 0x17b   :  { %2805 = vset.pattern.permute.xlu1 %v4629_v5  ;;  %v1478_v17 = vmul.f32 %v3362_v60, %v1361_v32  ;;  %v607_v2 = vmul.f32 %v3382_v63, %v516_v1 }
 0x17c   :  { %341 = vperm.xlu1 %2805, %v2848_v25   ;;  %2650 = vmatmul.msk.f32.vlgmr.msra.gmra.mxu1 %vm739_vm0, %v949_v57  ;;  %v673_v8 = vadd.f32 %v3392_v31, %v637_v11  ;;  %v1832_v57 = vmul.f32 %v3382_v63, %v1742_v24 }
 0x17d   :  { %v1670_v21 = vadd.f32 %v1638_v15, %v1478_v17  ;;  %2691 = vmatmul.msk.f32.gmra.mxu2 %vm739_vm0, %v1925_v35  ;;  %v3748_v17 = vld [vmem:[%s4591_s1 + $0xf0] sm:$0xff] }
 0x17e   :  { %v705_v45 = vmax.f32 %v673_v8, 0.0 }
 0x17f   :  { %v1862_v49 = vadd.f32 %v1830_v10, %v1670_v21  ;;  %2806 = vset.pattern.permute.xlu2 %v4631_v3 }
 0x180   :  { %535 = vperm.xlu2 %2806, %v2848_v25   ;;  %1613 = vperm.xlu0 %2820, %v3692_v62   ;;  %v1550_v18 = vpop.permute.xlu2 %1549 }
 0x181   :  { %v1894_v6 = vadd.f32 %v3392_v31, %v1862_v49  ;;  %v1640_v15 = vmul.f32 %v3367_v16, %v1550_v18 }
 0x182   :  { %v1750_v40 = vpop.permute.xlu0 %1749 }
 0x183   :  { %v504_v0 = vpop.permute.xlu1 %503  ;;  %v1926_v47 = vmax.f32 %v1894_v6, 0.0  ;;  %v250_v6 = vmul.f32 %v3362_v60, %v3164_v38 }
 0x184   :  { %1577 = vperm.xlu1 %2805, %v3515_v22   ;;  %v604_v48 = vmul.f32 %v3382_v63, %v504_v0 }
 0x185   :  { %2692 = vmatmul.msk.f32.gmra.mxu2 %vm739_vm0, %v1926_v47 }
 0x186   :  { %v636_v39 = vadd.f32 %v604_v48, %v442_v29  ;;  %v444_v29 = vadd.f32 %v412_v33, %v250_v6 }
 0x188   :  { %1769 = vperm.xlu2 %2806, %v3515_v22   ;;  %2828 = vset.pattern.permute.xlu0 %v4631_v3  ;;  %v672_v50 = vadd.f32 %v3392_v31, %v636_v39  ;;  %v2850_v22 = vld [vmem:[%s4590_s0 + $0x90] sm:$0xff]  ;;  %v3771_v39 = vld [vmem:[%s4591_s1 + $0xf8] sm:$0xff] }
 0x189   :  { %575 = vperm.xlu0 %2828, %v3718_v51   ;;  %v3721_v30 = vpop.permute.xlu2 %1375 }
 0x18a   :  { %v704_v55 = vmax.f32 %v672_v50, 0.0 }
 0x18b   :  { %v1738_v59 = vpop.permute.xlu1 %1737 }
 0x18c   :  { %345 = vperm.xlu1 %2805, %v2850_v22   ;;  %v1831_v13 = vmul.f32 %v3382_v63, %v1738_v59  ;;  %2627 = vmatmul.msk.f32.gmra.mxu0 %vm739_vm0, %v704_v55  ;;  %v639_v55 = vadd.f32 %v607_v2, %v3386_v41 }
 0x18d   :  { %v2061_v37 = vpop.f32.mrf.mxu2 }
 0x18e   :  { %v1863_v28 = vadd.f32 %v1831_v13, %v1671_v56  ;;  %v2062_v61 = vadd.f32 %v3672_v26, %v2061_v37  ;;  %v3786_v13 = vpop.permute.xlu0 %1757  ;;  %v1481_v37 = vmul.f32 %v3362_v60, %v3721_v30  ;;  %v3799_v30 = vld [vmem:[%s4590_s0 + $0xf8] sm:$0xff] }
 0x190   :  { %v2157_v42 = vmax.f32 %v2062_v61, 0.0  ;;  %539 = vperm.xlu2 %2806, %v2850_v22   ;;  %v1895_v54 = vadd.f32 %v3392_v31, %v1863_v28 }
 0x191   :  { %579 = vperm.xlu0 %2828, %v3734_v58  }
 0x192   :  { %2714 = vmatmul.msk.f32.vlgmr.msra.gmra.mxu3 %vm739_vm0, %v2157_v42  ;;  %v1746_v9 = vpop.permute.xlu2 %1745  ;;  %v1927_v20 = vmax.f32 %v1895_v54, 0.0  ;;  %v675_v42 = vadd.f32 %v3392_v31, %v639_v55 }
 0x193   :  { %v1833_v28 = vmul.f32 %v3382_v63, %v1746_v9 }
 0x194   :  { %1581 = vperm.xlu1 %2805, %v3535_v53   ;;  %v1371_v43 = vpop.permute.xlu1 %1370  ;;  %2628 = vmatmul.msk.f32.gmra.mxu0 %vm739_vm0, %v705_v45  ;;  %v707_v9 = vmax.f32 %v675_v42, 0.0  ;;  %v1299_v42 = vld [vmem:[%s4591_s1 + $0xb8] sm:$0xff] }
 0x195   :  { %v1480_v32 = vmul.f32 %v3362_v60, %v1371_v43  ;;  %v2064_v35 = vpop.f32.mrf.mxu2  ;;  %2693 = vmatmul.msk.f32.gmra.mxu2 %vm739_vm0, %v1927_v20 }
 0x196   :  { %v2065_v10 = vadd.f32 %v3672_v26, %v2064_v35  ;;  %v2854_v35 = vld [vmem:[%s4590_s0 + $0xa0] sm:$0xff]  ;;  %v3813_v33 = vpop.permute.xlu0 %531 }
 0x197   :  { %v1672_v25 = vadd.f32 %v1640_v15, %v1480_v32 }
 0x198   :  { %v2158_v21 = vmax.f32 %v2065_v10, 0.0  ;;  %1773 = vperm.xlu2 %2806, %v3535_v53   ;;  %v2852_v53 = vld [vmem:[%s4590_s0 + $0x98] sm:$0xff] }
 0x199   :  { %v1864_v49 = vadd.f32 %v1832_v57, %v1672_v25  ;;  %1813 = vperm.xlu0 %2828, %v3748_v17  }
 0x19a   :  { %2715 = vmatmul.msk.f32.gmra.mxu3 %vm739_vm0, %v2158_v21  ;;  %v1834_v21 = vmul.f32 %v3382_v63, %v1750_v40 }
 0x19b   :  { %v1558_v36 = vpop.permute.xlu2 %1557  ;;  %v1896_v18 = vadd.f32 %v3392_v31, %v1864_v49 }
 0x19c   :  { %2807 = vset.pattern.permute.xlu1 %v4631_v3  ;;  %v1642_v15 = vmul.f32 %v3367_v16, %v1558_v36 }
 0x19d   :  { %543 = vperm.xlu1 %2807, %v2852_v53   ;;  %v512_v0 = vpop.permute.xlu1 %511  ;;  %v1928_v47 = vmax.f32 %v1896_v18, 0.0  ;;  %v4635_v53 = vld [vmem:[#allocation24_spill] sm:$0xff] }
 0x19e   :  { %v606_v44 = vmul.f32 %v3382_v63, %v512_v0  ;;  %v2067_v48 = vpop.f32.mrf.mxu2  ;;  %v414_v40 = vmul.f32 %v3367_v16, %v4635_v53 }
 0x19f   :  { %v2068_v38 = vadd.f32 %v3672_v26, %v2067_v48  ;;  %v856_v7 = vpop.f32.mrf.mxu0  ;;  %2694 = vmatmul.msk.f32.gmra.mxu2 %vm739_vm0, %v1928_v47 }
 0x1a0   :  { %v638_v46 = vadd.f32 %v606_v44, %v444_v29  ;;  %2808 = vset.pattern.permute.xlu2 %v4628_v34  ;;  %v857_v4 = vadd.f32 %v3672_v26, %v856_v7  ;;  %v4636_v29 = vld [vmem:[#allocation9_spill] sm:$0xff] }
 0x1a1   :  { %v2159_v50 = vmax.f32 %v2068_v38, 0.0  ;;  %1415 = vperm.xlu2 %2808, %v1297_v52   ;;  %2834 = vset.pattern.permute.xlu0 %v4628_v34  ;;  %v252_v44 = vmul.f32 %v3362_v60, %v4636_v29  ;;  %v4637_v38 = vld [vmem:[#allocation23_spill] sm:$0xff] }
 0x1a2   :  { %v950_v24 = vmax.f32 %v857_v4, 0.0  ;;  %1465 = vperm.xlu0 %2834, %v3771_v39   ;;  %v674_v11 = vadd.f32 %v3392_v31, %v638_v46  ;;  %v415_v7 = vmul.f32 %v3367_v16, %v4637_v38  ;;  %v3828_v46 = vpop.permute.xlu0 %1765 }
 0x1a3   :  { %2716 = vmatmul.msk.f32.gmra.mxu3 %vm739_vm0, %v2159_v50  ;;  %v446_v2 = vadd.f32 %v414_v40, %v252_v44 }
 0x1a4   :  { %v3781_v59 = vpop.permute.xlu2 %1385  ;;  %2651 = vmatmul.msk.f32.gmra.mxu1 %vm739_vm0, %v950_v24  ;;  %v706_v56 = vmax.f32 %v674_v11, 0.0  ;;  %v4638_v11 = vld [vmem:[#allocation5_spill] sm:$0xff] }
 0x1a5   :  { %2809 = vset.pattern.permute.xlu1 %v4629_v5  ;;  %v253_v55 = vmul.f32 %v3362_v60, %v4638_v11 }
 0x1a6   :  { %1585 = vperm.xlu1 %2809, %v1297_v52   ;;  %v1554_v22 = vpop.permute.xlu1 %1553  ;;  %2629 = vmatmul.msk.f32.gmra.mxu0 %vm739_vm0, %v706_v56 }
 0x1a7   :  { %v1641_v41 = vmul.f32 %v3367_v16, %v1554_v22  ;;  %v859_v61 = vpop.f32.mrf.mxu0 }
 0x1a8   :  { %v860_v8 = vadd.f32 %v3672_v26, %v859_v61  ;;  %v1483_v61 = vmul.f32 %v3362_v60, %v3781_v59 }
 0x1a9   :  { %v1673_v54 = vadd.f32 %v1641_v41, %v1481_v37  ;;  %2810 = vset.pattern.permute.xlu2 %v4631_v3  ;;  %v2855_v37 = vld [vmem:[%s4590_s0 + $0xa8] sm:$0xff]  ;;  %v447_v41 = vadd.f32 %v415_v7, %v253_v55 }
 0x1aa   :  { %v951_v45 = vmax.f32 %v860_v8, 0.0  ;;  %1777 = vperm.xlu2 %2810, %v1297_v52   ;;  %2835 = vset.pattern.permute.xlu0 %v4629_v5  ;;  %v4639_v55 = vld [vmem:[#allocation25_spill] sm:$0xff] }
 0x1ab   :  { %v1865_v20 = vadd.f32 %v1833_v28, %v1673_v54  ;;  %397 = vperm.xlu0 %2835, %v3799_v30  }
 0x1ac   :  { %2652 = vmatmul.msk.f32.gmra.mxu1 %vm739_vm0, %v951_v45  ;;  %v1643_v45 = vmul.f32 %v3367_v16, %v3487_v27  ;;  %v3857_v16 = vpop.permute.xlu0 %551 }
 0x1ad   :  { %v1897_v1 = vadd.f32 %v3392_v31, %v1865_v20  ;;  %v524_v43 = vpop.permute.xlu2 %523 }
 0x1ae   :  { %2811 = vset.pattern.permute.xlu1 %v4631_v3  ;;  %v2070_v57 = vpop.f32.mrf.mxu2  ;;  %2630 = vmatmul.msk.f32.gmra.mxu0 %vm739_vm0, %v707_v9  ;;  %v1675_v59 = vadd.f32 %v1643_v45, %v1483_v61 }
 0x1af   :  { %v2071_v32 = vadd.f32 %v3672_v26, %v2070_v57  ;;  %547 = vperm.xlu1 %2811, %v2854_v35   ;;  %v1381_v10 = vpop.permute.xlu1 %1380  ;;  %v1929_v25 = vmax.f32 %v1897_v1, 0.0 }
 0x1b0   :  { %v1482_v49 = vmul.f32 %v3362_v60, %v1381_v10 }
 0x1b1   :  { %v2160_v36 = vmax.f32 %v2071_v32, 0.0  ;;  %2695 = vmatmul.msk.f32.gmra.mxu2 %vm739_vm0, %v1929_v25 }
 0x1b2   :  { %v1674_v18 = vadd.f32 %v1642_v15, %v1482_v49  ;;  %2812 = vset.pattern.permute.xlu2 %v4628_v34  ;;  %v3865_v49 = vld [vmem:[%s4592_s2 + $0x1] ss:$0 sm:$0xff] }
 0x1b3   :  { %1420 = vperm.xlu2 %2812, %v3644_v19   ;;  %2717 = vmatmul.msk.f32.gmra.mxu3 %vm739_vm0, %v2160_v36 }
 0x1b4   :  { %v1866_v6 = vadd.f32 %v1834_v21, %v1674_v18  ;;  %2837 = vset.pattern.permute.xlu0 %v4631_v3 }
 0x1b6   :  { %v1898_v0 = vadd.f32 %v3392_v31, %v1866_v6  ;;  %v1566_v47 = vpop.permute.xlu2 %1565 }
 0x1b7   :  { %1781 = vperm.xlu1 %2811, %v3644_v19   ;;  %v609_v19 = vmul.f32 %v3382_v63, %v524_v43  ;;  %v1644_v36 = vmul.f32 %v3865_v49, %v1566_v47  ;;  %v3881_v47 = vld [vmem:[%s4592_s2 + $0x2] ss:$0 sm:$0xff] }
 0x1b8   :  { %v520_v48 = vpop.permute.xlu1 %519  ;;  %v1930_v52 = vmax.f32 %v1898_v0, 0.0  ;;  %v1836_v29 = vmul.f32 %v3881_v47, %v3786_v13  ;;  %v611_v61 = vmul.f32 %v3881_v47, %v3813_v33 }
 0x1b9   :  { %v608_v4 = vmul.f32 %v3382_v63, %v520_v48  ;;  %v862_v50 = vpop.f32.mrf.mxu0  ;;  %v641_v20 = vadd.f32 %v609_v19, %v447_v41  ;;  %v2859_v48 = vld [vmem:[%s4590_s0 + $0xb0] sm:$0xff]  ;;  %v417_v19 = vmul.f32 %v3865_v49, %v4639_v55 }
 0x1ba   :  { %v863_v24 = vadd.f32 %v3672_v26, %v862_v50  ;;  %2696 = vmatmul.msk.f32.gmra.mxu2 %vm739_vm0, %v1930_v52  ;;  %v3888_v52 = vpop.permute.xlu0 %555 }
 0x1bb   :  { %v640_v56 = vadd.f32 %v608_v4, %v446_v2  ;;  %2813 = vset.pattern.permute.xlu2 %v4629_v5  ;;  %v677_v35 = vadd.f32 %v3392_v31, %v641_v20  ;;  %v3894_v2 = vld [vmem:[%s4593_s3] ss:$0 sm:$0xff] }
 0x1bc   :  { %v952_v22 = vmax.f32 %v863_v24, 0.0  ;;  %357 = vperm.xlu2 %2813, %v2855_v37   ;;  %v2073_v28 = vpop.f32.mrf.mxu2  ;;  %v4640_v37 = vld [vmem:[#allocation11_spill] sm:$0xff] }
 0x1bd   :  { %v2074_v8 = vadd.f32 %v3672_v26, %v2073_v28  ;;  %v676_v54 = vadd.f32 %v3392_v31, %v640_v56  ;;  %v709_v21 = vmax.f32 %v677_v35, 0.0 }
 0x1be   :  { %2653 = vmatmul.msk.f32.gmra.mxu1 %vm739_vm0, %v952_v22 }
 0x1bf   :  { %v2161_v9 = vmax.f32 %v2074_v8, 0.0  ;;  %2814 = vset.pattern.permute.xlu1 %v4628_v34  ;;  %v708_v1 = vmax.f32 %v676_v54, 0.0  ;;  %v3851_v15 = vpop.permute.xlu2 %1395  ;;  %v4641_v8 = vld [vmem:[#allocation26_spill] sm:$0xff] }
 0x1c0   :  { %1425 = vperm.xlu1 %2814, %v1299_v42   ;;  %v1754_v60 = vpop.permute.xlu1 %1753 }
 0x1c1   :  { %v1835_v43 = vmul.f32 %v3382_v63, %v1754_v60  ;;  %2718 = vmatmul.msk.f32.gmra.mxu3 %vm739_vm0, %v2161_v9  ;;  %v865_v57 = vpop.f32.mrf.mxu0  ;;  %2631 = vmatmul.msk.f32.gmra.mxu0 %vm739_vm0, %v708_v1 }
 0x1c2   :  { %v866_v32 = vadd.f32 %v3672_v26, %v865_v57  ;;  %v3911_v20 = vpop.permute.xlu0 %1789 }
 0x1c3   :  { %v1867_v27 = vadd.f32 %v1835_v43, %v1675_v59  ;;  %v2861_v43 = vld [vmem:[%s4590_s0 + $0xb8] sm:$0xff] }
 0x1c4   :  { %v953_v10 = vmax.f32 %v866_v32, 0.0  ;;  %1593 = vperm.xlu2 %2813, %v1299_v42  }
 0x1c5   :  { %v1899_v25 = vadd.f32 %v3392_v31, %v1867_v27  ;;  %v3873_v31 = vld [vmem:[%s4592_s2] ss:$0 sm:$0xff] }
 0x1c6   :  { %2654 = vmatmul.msk.f32.gmra.mxu1 %vm739_vm0, %v953_v10  ;;  %v255_v28 = vmul.f32 %v3873_v31, %v4640_v37  ;;  %v1485_v32 = vmul.f32 %v3873_v31, %v3851_v15 }
 0x1c7   :  { %v1931_v63 = vmax.f32 %v1899_v25, 0.0 }
 0x1c8   :  { %2815 = vset.pattern.permute.xlu1 %v4631_v3  ;;  %v1762_v18 = vpop.permute.xlu2 %1761  ;;  %v449_v9 = vadd.f32 %v417_v19, %v255_v28 }
 0x1c9   :  { %1785 = vperm.xlu1 %2815, %v1299_v42   ;;  %v1391_v6 = vpop.permute.xlu1 %1390  ;;  %2632 = vmatmul.msk.f32.gmra.mxu0 %vm739_vm0, %v709_v21  ;;  %v1837_v27 = vmul.f32 %v3881_v47, %v1762_v18 }
 0x1ca   :  { %v1484_v53 = vmul.f32 %v3873_v31, %v1391_v6  ;;  %2697 = vmatmul.msk.f32.gmra.mxu2 %vm739_vm0, %v1931_v63  ;;  %v2076_v40 = vpop.f32.mrf.mxu2  ;;  %v643_v60 = vadd.f32 %v611_v61, %v449_v9  ;;  %v1406_v6 = vpop.permute.xlu0 %1405  ;;  %v4642_v61 = vld [vmem:[#allocation6_spill] sm:$0xff] }
 0x1cb   :  { %v2077_v0 = vadd.f32 %v3672_v26, %v2076_v40 }
 0x1cc   :  { %v1676_v44 = vadd.f32 %v1644_v36, %v1484_v53  ;;  %361 = vperm.xlu2 %2813, %v2859_v48   ;;  %v679_v21 = vadd.f32 %v3894_v2, %v643_v60 }
 0x1cd   :  { %v2162_v38 = vmax.f32 %v2077_v0, 0.0 }
 0x1ce   :  { %v1868_v7 = vadd.f32 %v1836_v29, %v1676_v44  ;;  %v711_v0 = vmax.f32 %v679_v21, 0.0 }
 0x1cf   :  { %2719 = vmatmul.msk.f32.gmra.mxu3 %vm739_vm0, %v2162_v38 }
 0x1d0   :  { %v1900_v4 = vadd.f32 %v3894_v2, %v1868_v7 }
 0x1d1   :  { %2816 = vset.pattern.permute.xlu1 %v4628_v34  ;;  %v1574_v13 = vpop.permute.xlu2 %1573 }
 0x1d2   :  { %1430 = vperm.xlu1 %2816, %v3496_v23   ;;  %v1932_v50 = vmax.f32 %v1900_v4, 0.0  ;;  %v1646_v44 = vmul.f32 %v3865_v49, %v1574_v13  ;;  %v1411_v55 = vpop.permute.xlu0 %1410  ;;  %v2862_v13 = vld [vmem:[%s4590_s0 + $0xc0] sm:$0xff] }
 0x1d3   :  { %v528_v24 = vpop.permute.xlu1 %527  ;;  %v2079_v11 = vpop.f32.mrf.mxu2 }
 0x1d4   :  { %v610_v56 = vmul.f32 %v3881_v47, %v528_v24  ;;  %1597 = vperm.xlu2 %2813, %v3496_v23   ;;  %v2080_v22 = vadd.f32 %v3672_v26, %v2079_v11  ;;  %2698 = vmatmul.msk.f32.gmra.mxu2 %vm739_vm0, %v1932_v50  ;;  %v1838_v50 = vmul.f32 %v3881_v47, %v3828_v46 }
 0x1d5   :  { %v868_v41 = vpop.f32.mrf.mxu0  ;;  %v256_v46 = vmul.f32 %v3873_v31, %v4642_v61 }
 0x1d6   :  { %v642_v42 = vadd.f32 %v610_v56, %v4641_v8  ;;  %v2163_v54 = vmax.f32 %v2080_v22, 0.0  ;;  %v869_v45 = vadd.f32 %v3672_v26, %v868_v41 }
 0x1d8   :  { %v954_v23 = vmax.f32 %v869_v45, 0.0  ;;  %2720 = vmatmul.msk.f32.gmra.mxu3 %vm739_vm0, %v2163_v54  ;;  %v678_v1 = vadd.f32 %v3894_v2, %v642_v42 }
 0x1da   :  { %2818 = vset.pattern.permute.xlu1 %v4629_v5  ;;  %2655 = vmatmul.msk.f32.gmra.mxu1 %vm739_vm0, %v954_v23  ;;  %v536_v59 = vpop.permute.xlu2 %535  ;;  %v710_v33 = vmax.f32 %v678_v1, 0.0 }
 0x1db   :  { %365 = vperm.xlu1 %2818, %v2861_v43   ;;  %v612_v8 = vmul.f32 %v3881_v47, %v536_v59  ;;  %v3955_v59 = vpop.permute.xlu0 %1435 }
 0x1dc   :  { %v1570_v57 = vpop.permute.xlu1 %1569  ;;  %2819 = vset.pattern.permute.xlu2 %v4631_v3  ;;  %2633 = vmatmul.msk.f32.gmra.mxu0 %vm739_vm0, %v710_v33  ;;  %v1487_v33 = vmul.f32 %v3873_v31, %v1406_v6 }
 0x1dd   :  { %v1645_v35 = vmul.f32 %v3865_v49, %v1570_v57  ;;  %559 = vperm.xlu2 %2819, %v2861_v43   ;;  %v871_v10 = vpop.f32.mrf.mxu0 }
 0x1de   :  { %v872_v25 = vadd.f32 %v3672_v26, %v871_v10 }
 0x1df   :  { %v1677_v63 = vadd.f32 %v1645_v35, %v1485_v32 }
 0x1e0   :  { %v955_v36 = vmax.f32 %v872_v25, 0.0 }
 0x1e1   :  { %v1869_v53 = vadd.f32 %v1837_v27, %v1677_v63 }
 0x1e2   :  { %2656 = vmatmul.msk.f32.gmra.mxu1 %vm739_vm0, %v955_v36  ;;  %v2082_v40 = vpop.f32.mrf.mxu2  ;;  %v1770_v18 = vpop.permute.xlu2 %1769 }
 0x1e3   :  { %1601 = vperm.xlu1 %2818, %v3552_v12   ;;  %v2083_v15 = vadd.f32 %v3672_v26, %v2082_v40  ;;  %v1901_v29 = vadd.f32 %v3894_v2, %v1869_v53  ;;  %v1839_v25 = vmul.f32 %v3881_v47, %v1770_v18  ;;  %v2863_v53 = vld [vmem:[%s4590_s0 + $0xc8] sm:$0xff] }
 0x1e4   :  { %2634 = vmatmul.msk.f32.gmra.mxu0 %vm739_vm0, %v711_v0 }
 0x1e5   :  { %v2164_v48 = vmax.f32 %v2083_v15, 0.0  ;;  %v1401_v38 = vpop.permute.xlu1 %1400  ;;  %1793 = vperm.xlu2 %2819, %v3552_v12   ;;  %v1933_v7 = vmax.f32 %v1901_v29, 0.0  ;;  %v4643_v15 = vld [vmem:[#allocation14_spill] sm:$0xff]  ;;  %v3977_v29 = vpop.permute.xlu0 %1440 }
 0x1e6   :  { %v1486_v4 = vmul.f32 %v3873_v31, %v1401_v38  ;;  %v257_v18 = vmul.f32 %v3873_v31, %v4643_v15 }
 0x1e7   :  { %2699 = vmatmul.msk.f32.gmra.mxu2 %vm739_vm0, %v1933_v7  ;;  %2721 = vmatmul.msk.f32.gmra.mxu3 %vm739_vm0, %v2164_v48 }
 0x1e8   :  { %v1678_v24 = vadd.f32 %v1646_v44, %v1486_v4 }
 0x1ea   :  { %v1870_v11 = vadd.f32 %v1838_v50, %v1678_v24  ;;  %v540_v19 = vpop.permute.xlu2 %539 }
 0x1eb   :  { %369 = vperm.xlu1 %2818, %v2862_v13   ;;  %v613_v7 = vmul.f32 %v3881_v47, %v540_v19 }
 0x1ec   :  { %v1902_v12 = vadd.f32 %v3894_v2, %v1870_v11 }
 0x1ed   :  { %563 = vperm.xlu2 %2819, %v2862_v13   ;;  %v2085_v56 = vpop.f32.mrf.mxu2 }
 0x1ee   :  { %v342_v22 = vpop.permute.xlu1 %341  ;;  %v2086_v37 = vadd.f32 %v3672_v26, %v2085_v56  ;;  %v874_v28 = vpop.f32.mrf.mxu0  ;;  %v1934_v41 = vmax.f32 %v1902_v12, 0.0  ;;  %v1488_v12 = vmul.f32 %v3873_v31, %v1411_v55 }
 0x1ef   :  { %v418_v42 = vmul.f32 %v3865_v49, %v342_v22  ;;  %v875_v54 = vadd.f32 %v3672_v26, %v874_v28 }
 0x1f0   :  { %v2165_v45 = vmax.f32 %v2086_v37, 0.0  ;;  %2700 = vmatmul.msk.f32.gmra.mxu2 %vm739_vm0, %v1934_v41  ;;  %v350_v41 = vpop.permute.xlu0 %349 }
 0x1f1   :  { %v450_v9 = vadd.f32 %v418_v42, %v256_v46  ;;  %v956_v23 = vmax.f32 %v875_v54, 0.0 }
 0x1f2   :  { %2722 = vmatmul.msk.f32.gmra.mxu3 %vm739_vm0, %v2165_v45  ;;  %v1774_v60 = vpop.permute.xlu2 %1773 }
 0x1f3   :  { %v644_v1 = vadd.f32 %v612_v8, %v450_v9  ;;  %1605 = vperm.xlu1 %2818, %v3572_v14   ;;  %2657 = vmatmul.msk.f32.gmra.mxu1 %vm739_vm0, %v956_v23  ;;  %v1840_v61 = vmul.f32 %v3881_v47, %v1774_v60  ;;  %v420_v9 = vmul.f32 %v3865_v49, %v350_v41 }
 0x1f5   :  { %1797 = vperm.xlu2 %2819, %v3572_v14   ;;  %v680_v43 = vadd.f32 %v3894_v2, %v644_v1  ;;  %v1303_v14 = vld [vmem:[%s4591_s1 + $0xd8] sm:$0xff] }
 0x1f6   :  { %v1578_v57 = vpop.permute.xlu1 %1577  ;;  %v877_v32 = vpop.f32.mrf.mxu0 }
 0x1f7   :  { %v1647_v27 = vmul.f32 %v3865_v49, %v1578_v57  ;;  %v878_v35 = vadd.f32 %v3672_v26, %v877_v32  ;;  %v712_v10 = vmax.f32 %v680_v43, 0.0  ;;  %v2864_v57 = vld [vmem:[%s4590_s0 + $0xd0] sm:$0xff] }
 0x1f9   :  { %v1679_v21 = vadd.f32 %v1647_v27, %v1487_v33  ;;  %v957_v63 = vmax.f32 %v878_v35, 0.0  ;;  %2635 = vmatmul.msk.f32.gmra.mxu0 %vm739_vm0, %v712_v10  ;;  %v4644_v33 = vld [vmem:[#allocation13_spill] sm:$0xff] }
 0x1fa   :  { %v258_v43 = vmul.f32 %v3873_v31, %v4644_v33 }
 0x1fb   :  { %v1871_v36 = vadd.f32 %v1839_v25, %v1679_v21  ;;  %2821 = vset.pattern.permute.xlu1 %v4631_v3  ;;  %2658 = vmatmul.msk.f32.gmra.mxu1 %vm739_vm0, %v957_v63  ;;  %v3968_v6 = vpop.permute.xlu2 %1415 }
 0x1fc   :  { %567 = vperm.xlu1 %2821, %v2863_v53   ;;  %v452_v35 = vadd.f32 %v420_v9, %v258_v43 }
 0x1fd   :  { %2822 = vset.pattern.permute.xlu2 %v4628_v34  ;;  %v1903_v40 = vadd.f32 %v3894_v2, %v1871_v36 }
 0x1fe   :  { %v346_v0 = vpop.permute.xlu1 %345  ;;  %1445 = vperm.xlu2 %2822, %v1303_v14  }
 0x1ff   :  { %v419_v44 = vmul.f32 %v3865_v49, %v346_v0  ;;  %v1935_v48 = vmax.f32 %v1903_v40, 0.0  ;;  %v4645_v0 = vld [vmem:[#allocation16_spill] sm:$0xff] }
 0x200   :  { %v2088_v38 = vpop.f32.mrf.mxu2  ;;  %v260_v15 = vmul.f32 %v3873_v31, %v4645_v0 }
 0x201   :  { %v451_v4 = vadd.f32 %v419_v44, %v257_v18  ;;  %v2089_v50 = vadd.f32 %v3672_v26, %v2088_v38  ;;  %2701 = vmatmul.msk.f32.gmra.mxu2 %vm739_vm0, %v1935_v48  ;;  %v616_v44 = vmul.f32 %v3881_v47, %v3857_v16  ;;  %v1489_v48 = vmul.f32 %v3873_v31, %v3968_v6  ;;  %v1305_v6 = vld [vmem:[%s4591_s1 + $0xe8] sm:$0xff] }
 0x203   :  { %v645_v24 = vadd.f32 %v613_v7, %v451_v4  ;;  %v2166_v11 = vmax.f32 %v2089_v50, 0.0  ;;  %v354_v7 = vpop.permute.xlu0 %353 }
 0x204   :  { %2823 = vset.pattern.permute.xlu1 %v4629_v5  ;;  %v1778_v13 = vpop.permute.xlu2 %1777 }
 0x205   :  { %1609 = vperm.xlu1 %2823, %v1303_v14   ;;  %2723 = vmatmul.msk.f32.gmra.mxu3 %vm739_vm0, %v2166_v11  ;;  %v681_v56 = vadd.f32 %v3894_v2, %v645_v24  ;;  %v1841_v4 = vmul.f32 %v3881_v47, %v1778_v13 }
 0x206   :  { %v1582_v22 = vpop.permute.xlu1 %1581  ;;  %2824 = vset.pattern.permute.xlu2 %v4631_v3 }
 0x207   :  { %v1648_v19 = vmul.f32 %v3865_v49, %v1582_v22  ;;  %1801 = vperm.xlu2 %2824, %v1303_v14   ;;  %v713_v37 = vmax.f32 %v681_v56, 0.0 }
 0x208   :  { %v2091_v28 = vpop.f32.mrf.mxu2 }
 0x209   :  { %v1680_v46 = vadd.f32 %v1648_v19, %v1488_v12  ;;  %2636 = vmatmul.msk.f32.gmra.mxu0 %vm739_vm0, %v713_v37  ;;  %v2092_v55 = vadd.f32 %v3672_v26, %v2091_v28  ;;  %v880_v8 = vpop.f32.mrf.mxu0  ;;  %v421_v19 = vmul.f32 %v3865_v49, %v354_v7  ;;  %v4646_v28 = vld [vmem:[#allocation7_spill] sm:$0xff] }
 0x20a   :  { %v881_v42 = vadd.f32 %v3672_v26, %v880_v8 }
 0x20b   :  { %v1872_v54 = vadd.f32 %v1840_v61, %v1680_v46  ;;  %v2167_v45 = vmax.f32 %v2092_v55, 0.0 }
 0x20c   :  { %v958_v23 = vmax.f32 %v881_v42, 0.0  ;;  %v1590_v42 = vpop.permute.xlu0 %1589 }
 0x20d   :  { %2825 = vset.pattern.permute.xlu1 %v4631_v3  ;;  %v1421_v1 = vpop.permute.xlu2 %1420  ;;  %2724 = vmatmul.msk.f32.gmra.mxu3 %vm739_vm0, %v2167_v45  ;;  %v1904_v60 = vadd.f32 %v3894_v2, %v1872_v54  ;;  %v1650_v9 = vmul.f32 %v3865_v49, %v1590_v42 }
 0x20e   :  { %571 = vperm.xlu1 %2825, %v2864_v57   ;;  %2659 = vmatmul.msk.f32.gmra.mxu1 %vm739_vm0, %v958_v23  ;;  %v1490_v23 = vmul.f32 %v3873_v31, %v1421_v1 }
 0x20f   :  { %v544_v32 = vpop.permute.xlu1 %543  ;;  %2826 = vset.pattern.permute.xlu2 %v4628_v34  ;;  %v1936_v27 = vmax.f32 %v1904_v60, 0.0 }
 0x210   :  { %v614_v10 = vmul.f32 %v3881_v47, %v544_v32  ;;  %1450 = vperm.xlu2 %2826, %v3692_v62  }
 0x211   :  { %2702 = vmatmul.msk.f32.gmra.mxu2 %vm739_vm0, %v1936_v27  ;;  %v883_v25 = vpop.f32.mrf.mxu0 }
 0x212   :  { %v646_v21 = vadd.f32 %v614_v10, %v452_v35  ;;  %v884_v63 = vadd.f32 %v3672_v26, %v883_v25  ;;  %v1682_v35 = vadd.f32 %v1650_v9, %v1490_v23 }
 0x214   :  { %v959_v36 = vmax.f32 %v884_v63, 0.0  ;;  %v682_v14 = vadd.f32 %v3894_v2, %v646_v21  ;;  %v4647_v21 = vld [vmem:[#allocation15_spill] sm:$0xff] }
 0x215   :  { %v261_v63 = vmul.f32 %v3873_v31, %v4647_v21 }
 0x216   :  { %1805 = vperm.xlu1 %2825, %v3692_v62   ;;  %v358_v53 = vpop.permute.xlu2 %357  ;;  %2660 = vmatmul.msk.f32.gmra.mxu1 %vm739_vm0, %v959_v36  ;;  %v714_v40 = vmax.f32 %v682_v14, 0.0 }
 0x217   :  { %v422_v18 = vmul.f32 %v3865_v49, %v358_v53 }
 0x218   :  { %v1586_v38 = vpop.permute.xlu1 %1585  ;;  %2827 = vset.pattern.permute.xlu2 %v4629_v5  ;;  %2637 = vmatmul.msk.f32.gmra.mxu0 %vm739_vm0, %v714_v40  ;;  %v2094_v62 = vpop.f32.mrf.mxu2 }
 0x219   :  { %v454_v50 = vadd.f32 %v422_v18, %v260_v15  ;;  %v1649_v24 = vmul.f32 %v3865_v49, %v1586_v38  ;;  %v2095_v11 = vadd.f32 %v3672_v26, %v2094_v62  ;;  %381 = vperm.xlu2 %2827, %v3718_v51   ;;  %v259_v51 = vmul.f32 %v3873_v31, %v4646_v28 }
 0x21a   :  { %v617_v18 = vmul.f32 %v3881_v47, %v3888_v52 }
 0x21b   :  { %v648_v16 = vadd.f32 %v616_v44, %v454_v50  ;;  %v1681_v12 = vadd.f32 %v1649_v24, %v1489_v48  ;;  %v2168_v56 = vmax.f32 %v2095_v11, 0.0  ;;  %v453_v46 = vadd.f32 %v421_v19, %v259_v51 }
 0x21d   :  { %v1873_v22 = vadd.f32 %v1841_v4, %v1681_v12  ;;  %2725 = vmatmul.msk.f32.gmra.mxu3 %vm739_vm0, %v2168_v56  ;;  %v684_v15 = vadd.f32 %v3894_v2, %v648_v16  ;;  %v2865_v56 = vld [vmem:[%s4590_s0 + $0xe8] sm:$0xff] }
 0x21e   :  { %2829 = vset.pattern.permute.xlu1 %v4628_v34  ;;  %v1594_v13 = vpop.permute.xlu2 %1593 }
 0x21f   :  { %1455 = vperm.xlu1 %2829, %v1305_v6   ;;  %v1905_v37 = vadd.f32 %v3894_v2, %v1873_v22  ;;  %v716_v62 = vmax.f32 %v684_v15, 0.0  ;;  %v4071_v22 = vpop.f32.mrf.mxu3 }
 0x221   :  { %v548_v41 = vpop.permute.xlu1 %547  ;;  %1617 = vperm.xlu2 %2827, %v1305_v6   ;;  %v1937_v61 = vmax.f32 %v1905_v37, 0.0 }
 0x222   :  { %v615_v55 = vmul.f32 %v3881_v47, %v548_v41  ;;  %v2097_v8 = vpop.f32.mrf.mxu2 }
 0x223   :  { %v2098_v54 = vadd.f32 %v3672_v26, %v2097_v8  ;;  %2703 = vmatmul.msk.f32.gmra.mxu2 %vm739_vm0, %v1937_v61  ;;  %v886_v45 = vpop.f32.mrf.mxu0 }
 0x224   :  { %v647_v60 = vadd.f32 %v615_v55, %v453_v46  ;;  %v887_v33 = vadd.f32 %v3672_v26, %v886_v45 }
 0x225   :  { %v2169_v43 = vmax.f32 %v2098_v54, 0.0  ;;  %v4079_v54 = vpop.f32.mrf.mxu1 }
 0x226   :  { %v960_v57 = vmax.f32 %v887_v33, 0.0  ;;  %v362_v32 = vpop.permute.xlu2 %361  ;;  %v683_v27 = vadd.f32 %v3894_v2, %v647_v60 }
 0x227   :  { %2830 = vset.pattern.permute.xlu1 %v4631_v3  ;;  %2726 = vmatmul.msk.f32.gmra.mxu3 %vm739_vm0, %v2169_v43  ;;  %v423_v10 = vmul.f32 %v3865_v49, %v362_v32  ;;  %v4086_v60 = vpop.f32.mrf.mxu3  ;;  %v1844_v43 = vmul.f32 %v3881_v47, %v3911_v20 }
 0x228   :  { %1809 = vperm.xlu1 %2830, %v1305_v6   ;;  %2661 = vmatmul.msk.f32.gmra.mxu1 %vm739_vm0, %v960_v57  ;;  %v715_v25 = vmax.f32 %v683_v27, 0.0 }
 0x229   :  { %v1782_v1 = vpop.permute.xlu1 %1781  ;;  %385 = vperm.xlu2 %2827, %v3734_v58   ;;  %v455_v53 = vadd.f32 %v423_v10, %v261_v63 }
 0x22a   :  { %v1842_v36 = vmul.f32 %v3881_v47, %v1782_v1  ;;  %2638 = vmatmul.msk.f32.gmra.mxu0 %vm739_vm0, %v715_v25 }
 0x22b   :  { %v889_v14 = vpop.f32.mrf.mxu0  ;;  %v649_v38 = vadd.f32 %v617_v18, %v455_v53 }
 0x22c   :  { %v1874_v40 = vadd.f32 %v1842_v36, %v1682_v35  ;;  %v890_v0 = vadd.f32 %v3672_v26, %v889_v14  ;;  %v4648_v36 = vld [vmem:[#allocation8_spill] sm:$0xff] }
 0x22d   :  { %v685_v50 = vadd.f32 %v3894_v2, %v649_v38  ;;  %v4094_v25 = vpop.f32.mrf.mxu1 }
 0x22e   :  { %v961_v44 = vmax.f32 %v890_v0, 0.0  ;;  %v1598_v48 = vpop.permute.xlu2 %1597  ;;  %v1906_v58 = vadd.f32 %v3894_v2, %v1874_v40  ;;  %v4107_v0 = vld [vmem:[%s4595_s5] ss:$0 sm:$0xff] }
 0x22f   :  { %v717_v12 = vmax.f32 %v685_v50, 0.0  ;;  %v1652_v9 = vmul.f32 %v3865_v49, %v1598_v48  ;;  %v4100_v14 = vpop.f32.mrf.mxu3 }
 0x230   :  { %2831 = vset.pattern.permute.xlu1 %v4628_v34  ;;  %2662 = vmatmul.msk.f32.gmra.mxu1 %vm739_vm0, %v961_v44  ;;  %v1938_v7 = vmax.f32 %v1906_v58, 0.0 }
 0x231   :  { %1460 = vperm.xlu1 %2831, %v3748_v17   ;;  %1621 = vperm.xlu2 %2827, %v3748_v17   ;;  %v1651_v17 = vmul.f32 %v3865_v49, %v1594_v13 }
 0x232   :  { %v1426_v4 = vpop.permute.xlu1 %1425  ;;  %2639 = vmatmul.msk.f32.gmra.mxu0 %vm739_vm0, %v716_v62  ;;  %2704 = vmatmul.msk.f32.gmra.mxu2 %vm739_vm0, %v1938_v7 }
 0x233   :  { %v1491_v16 = vmul.f32 %v3873_v31, %v1426_v4  ;;  %v1493_v4 = vmul.f32 %v3873_v31, %v3955_v59 }
 0x234   :  { %v2100_v52 = vpop.f32.mrf.mxu2 }
 0x235   :  { %v2101_v24 = vadd.f32 %v3672_v26, %v2100_v52  ;;  %v1683_v19 = vadd.f32 %v1651_v17, %v1491_v16  ;;  %v4115_v62 = vpop.f32.mrf.mxu1 }
 0x237   :  { %v2170_v11 = vmax.f32 %v2101_v24, 0.0  ;;  %v560_v34 = vpop.permute.xlu2 %559  ;;  %v4119_v52 = vpop.f32.mrf.mxu3 }
 0x238   :  { %v618_v53 = vmul.f32 %v3881_v47, %v560_v34 }
 0x239   :  { %2832 = vset.pattern.permute.xlu1 %v4629_v5  ;;  %2727 = vmatmul.msk.f32.gmra.mxu3 %vm739_vm0, %v2170_v11 }
 0x23a   :  { %389 = vperm.xlu1 %2832, %v2865_v56   ;;  %2640 = vmatmul.msk.f32.gmra.mxu0 %vm739_vm0, %v717_v12 }
 0x23b   :  { %v1786_v6 = vpop.permute.xlu1 %1785  ;;  %2833 = vset.pattern.permute.xlu2 %v4631_v3 }
 0x23c   :  { %v1843_v37 = vmul.f32 %v3881_v47, %v1786_v6  ;;  %583 = vperm.xlu2 %2833, %v2865_v56  }
 0x23d   :  { %v2103_v5 = vpop.f32.mrf.mxu2 }
 0x23e   :  { %v1875_v28 = vadd.f32 %v1843_v37, %v1683_v19  ;;  %v2104_v13 = vadd.f32 %v3672_v26, %v2103_v5  ;;  %v892_v51 = vpop.f32.mrf.mxu0  ;;  %v4130_v37 = vpop.f32.mrf.mxu1 }
 0x23f   :  { %v893_v41 = vadd.f32 %v3672_v26, %v892_v51  ;;  %v1794_v61 = vpop.permute.xlu2 %1793 }
 0x240   :  { %v2171_v46 = vmax.f32 %v2104_v13, 0.0  ;;  %v1907_v55 = vadd.f32 %v3894_v2, %v1875_v28  ;;  %v4649_v28 = vld [vmem:[#allocation18_spill] sm:$0xff] }
 0x241   :  { %v962_v8 = vmax.f32 %v893_v41, 0.0  ;;  %v263_v13 = vmul.f32 %v3873_v31, %v4649_v28 }
 0x242   :  { %1625 = vperm.xlu1 %2832, %v3771_v39   ;;  %2728 = vmatmul.msk.f32.gmra.mxu3 %vm739_vm0, %v2171_v46  ;;  %v1939_v42 = vmax.f32 %v1907_v55, 0.0 }
 0x243   :  { %2663 = vmatmul.msk.f32.gmra.mxu1 %vm739_vm0, %v962_v8 }
 0x244   :  { %v1431_v45 = vpop.permute.xlu1 %1430  ;;  %2705 = vmatmul.msk.f32.gmra.mxu2 %vm739_vm0, %v1939_v42  ;;  %1817 = vperm.xlu2 %2833, %v3771_v39   ;;  %v2866_v39 = vld [vmem:[%s4590_s0 + $0xf0] sm:$0xff]  ;;  %v4134_v51 = vpop.f32.mrf.mxu3 }
 0x245   :  { %v1492_v23 = vmul.f32 %v3873_v31, %v1431_v45 }
 0x246   :  { %v895_v33 = vpop.f32.mrf.mxu0 }
 0x247   :  { %v1684_v57 = vadd.f32 %v1652_v9, %v1492_v23  ;;  %v896_v32 = vadd.f32 %v3672_v26, %v895_v33  ;;  %v564_v27 = vpop.permute.xlu2 %563  ;;  %v262_v26 = vmul.f32 %v3873_v31, %v4648_v36  ;;  %v374_v23 = vpop.permute.xlu0 %373 }
 0x248   :  { %v619_v46 = vmul.f32 %v3881_v47, %v564_v27 }
 0x249   :  { %v1876_v35 = vadd.f32 %v1844_v43, %v1684_v57  ;;  %v963_v10 = vmax.f32 %v896_v32, 0.0  ;;  %v1494_v32 = vmul.f32 %v3873_v31, %v3977_v29 }
 0x24a   :  { %393 = vperm.xlu1 %2832, %v2866_v39  }
 0x24b   :  { %v1908_v1 = vadd.f32 %v3894_v2, %v1876_v35  ;;  %2664 = vmatmul.msk.f32.gmra.mxu1 %vm739_vm0, %v963_v10 }
 0x24c   :  { %587 = vperm.xlu2 %2833, %v2866_v39   ;;  %v4148_v39 = vpop.f32.mrf.mxu1 }
 0x24d   :  { %v1940_v21 = vmax.f32 %v1908_v1, 0.0  ;;  %v366_v20 = vpop.permute.xlu1 %365  ;;  %v2106_v63 = vpop.f32.mrf.mxu2 }
 0x24e   :  { %v424_v40 = vmul.f32 %v3865_v49, %v366_v20  ;;  %v2107_v15 = vadd.f32 %v4107_v0, %v2106_v63 }
 0x24f   :  { %2706 = vmatmul.msk.f32.gmra.mxu2 %vm739_vm0, %v1940_v21  ;;  %v1798_v18 = vpop.permute.xlu2 %1797 }
 0x250   :  { %v456_v44 = vadd.f32 %v424_v40, %v262_v26  ;;  %v2172_v48 = vmax.f32 %v2107_v15, 0.0  ;;  %v1846_v1 = vmul.f32 %v3881_v47, %v1798_v18  ;;  %v426_v26 = vmul.f32 %v3865_v49, %v374_v23  ;;  %v4650_v40 = vld [vmem:[#allocation17_spill] sm:$0xff]  ;;  %v4651_v23 = vld [vmem:[#allocation10_spill] sm:$0xff] }
 0x251   :  { %v264_v15 = vmul.f32 %v3873_v31, %v4650_v40 }
 0x252   :  { %v650_v58 = vadd.f32 %v618_v53, %v456_v44  ;;  %2836 = vset.pattern.permute.xlu1 %v4631_v3  ;;  %2729 = vmatmul.msk.f32.gmra.mxu3 %vm739_vm0, %v2172_v48  ;;  %v1845_v3 = vmul.f32 %v3881_v47, %v1794_v61  ;;  %v4144_v35 = vpop.f32.mrf.mxu3  ;;  %v378_v44 = vpop.permute.xlu0 %377 }
 0x253   :  { %591 = vperm.xlu1 %2836, %v3799_v30   ;;  %v458_v18 = vadd.f32 %v426_v26, %v264_v15  ;;  %v4191_v26 = vld [vmem:[%s4597_s7] ss:$0 sm:$0xff] }
 0x254   :  { %v686_v38 = vadd.f32 %v3894_v2, %v650_v58  ;;  %v2309_v15 = vadd.f32 %v4191_v26, %v4100_v14 }
 0x255   :  { %v1602_v7 = vpop.permute.xlu1 %1601 }
 0x256   :  { %v1653_v50 = vmul.f32 %v3865_v49, %v1602_v7  ;;  %v718_v24 = vmax.f32 %v686_v38, 0.0 }
 0x257   :  { %v2109_v11 = vpop.f32.mrf.mxu2  ;;  %v4157_v7 = vpop.f32.mrf.mxu1 }
 0x258   :  { %v1685_v34 = vadd.f32 %v1653_v50, %v1493_v4  ;;  %2641 = vmatmul.msk.f32.gmra.mxu0 %vm739_vm0, %v718_v24  ;;  %v2110_v30 = vadd.f32 %v4107_v0, %v2109_v11  ;;  %v4125_v16 = vpop.permute.xlu2 %1445 }
 0x259   :  { %v898_v12 = vpop.f32.mrf.mxu0 }
 0x25a   :  { %v1877_v17 = vadd.f32 %v1845_v3, %v1685_v34  ;;  %v2173_v56 = vmax.f32 %v2110_v30, 0.0  ;;  %v899_v59 = vadd.f32 %v4107_v0, %v898_v12  ;;  %v1614_v12 = vpop.permute.xlu0 %1613 }
 0x25b   :  { %v2320_v50 = vpop.f32.mrf.mxu3 }
 0x25c   :  { %v1909_v6 = vadd.f32 %v3894_v2, %v1877_v17  ;;  %v964_v19 = vmax.f32 %v899_v59, 0.0  ;;  %2730 = vmatmul.msk.f32.gmra.mxu3 %vm739_vm0, %v2173_v56 }
 0x25d   :  { %v370_v5 = vpop.permute.xlu1 %369 }
 0x25e   :  { %v1941_v41 = vmax.f32 %v1909_v6, 0.0  ;;  %v425_v61 = vmul.f32 %v3865_v49, %v370_v5  ;;  %2665 = vmatmul.msk.f32.gmra.mxu1 %vm739_vm0, %v964_v19  ;;  %v1495_v5 = vmul.f32 %v3873_v31, %v4125_v16 }
 0x260   :  { %v457_v55 = vadd.f32 %v425_v61, %v263_v13  ;;  %2707 = vmatmul.msk.f32.gmra.mxu2 %vm739_vm0, %v1941_v41  ;;  %v4173_v61 = vpop.f32.mrf.mxu1 }
 0x261   :  { %v901_v8 = vpop.f32.mrf.mxu0  ;;  %v1802_v42 = vpop.permute.xlu2 %1801 }
 0x262   :  { %v651_v45 = vadd.f32 %v619_v46, %v457_v55  ;;  %v902_v9 = vadd.f32 %v4107_v0, %v901_v8  ;;  %v1847_v28 = vmul.f32 %v3881_v47, %v1802_v42 }
 0x264   :  { %v687_v33 = vadd.f32 %v3894_v2, %v651_v45  ;;  %v965_v43 = vmax.f32 %v902_v9, 0.0  ;;  %v427_v9 = vmul.f32 %v3865_v49, %v378_v44 }
 0x265   :  { %v1606_v57 = vpop.permute.xlu1 %1605 }
 0x266   :  { %v719_v10 = vmax.f32 %v687_v33, 0.0  ;;  %v1654_v27 = vmul.f32 %v3865_v49, %v1606_v57  ;;  %2666 = vmatmul.msk.f32.gmra.mxu1 %vm739_vm0, %v965_v43  ;;  %v265_v33 = vmul.f32 %v3873_v31, %v4651_v23  ;;  %v576_v43 = vpop.permute.xlu0 %575  ;;  %v4652_v57 = vld [vmem:[#allocation20_spill] sm:$0xff] }
 0x268   :  { %v1686_v21 = vadd.f32 %v1654_v27, %v1494_v32  ;;  %2642 = vmatmul.msk.f32.gmra.mxu0 %vm739_vm0, %v719_v10  ;;  %v266_v32 = vmul.f32 %v3873_v31, %v4652_v57 }
 0x26a   :  { %v1878_v20 = vadd.f32 %v1846_v1, %v1686_v21  ;;  %v1451_v63 = vpop.permute.xlu2 %1450  ;;  %v2112_v36 = vpop.f32.mrf.mxu2  ;;  %v459_v21 = vadd.f32 %v427_v9, %v265_v33 }
 0x26b   :  { %v2113_v29 = vadd.f32 %v4107_v0, %v2112_v36  ;;  %v4169_v13 = vpop.f32.mrf.mxu3 }
 0x26c   :  { %v1910_v53 = vadd.f32 %v3894_v2, %v1878_v20 }
 0x26d   :  { %v2174_v48 = vmax.f32 %v2113_v29, 0.0  ;;  %v622_v29 = vmul.f32 %v3881_v47, %v576_v43 }
 0x26e   :  { %v1942_v58 = vmax.f32 %v1910_v53, 0.0  ;;  %v568_v38 = vpop.permute.xlu1 %567 }
 0x26f   :  { %v620_v4 = vmul.f32 %v3881_v47, %v568_v38  ;;  %2731 = vmatmul.msk.f32.gmra.mxu3 %vm739_vm0, %v2174_v48 }
 0x270   :  { %2708 = vmatmul.msk.f32.gmra.mxu2 %vm739_vm0, %v1942_v58  ;;  %v4185_v20 = vpop.f32.mrf.mxu1  ;;  %v1496_v58 = vmul.f32 %v3873_v31, %v1451_v63 }
 0x271   :  { %v652_v24 = vadd.f32 %v620_v4, %v458_v18  ;;  %v1656_v4 = vmul.f32 %v3865_v49, %v1614_v12 }
 0x273   :  { %v688_v11 = vadd.f32 %v3894_v2, %v652_v24  ;;  %v382_v3 = vpop.permute.xlu2 %381  ;;  %v2115_v34 = vpop.f32.mrf.mxu2  ;;  %v2303_v24 = vadd.f32 %v4191_v26, %v4071_v22  ;;  %v2321_v22 = vadd.f32 %v4191_v26, %v2320_v50 }
 0x274   :  { %v2116_v30 = vadd.f32 %v4107_v0, %v2115_v34  ;;  %v428_v16 = vmul.f32 %v3865_v49, %v382_v3 }
 0x275   :  { %v720_v17 = vmax.f32 %v688_v11, 0.0  ;;  %v2326_v10 = vpop.f32.mrf.mxu3  ;;  %v2315_v11 = vadd.f32 %v4191_v26, %v4134_v51  ;;  %v2404_v43 = vmax.f32 %v2321_v22, 0.0 }
 0x276   :  { %v2175_v56 = vmax.f32 %v2116_v30, 0.0  ;;  %v904_v59 = vpop.f32.mrf.mxu0  ;;  %v460_v53 = vadd.f32 %v428_v16, %v266_v32  ;;  %v2327_v16 = vadd.f32 %v4191_v26, %v2326_v10 }
 0x277   :  { %v905_v6 = vadd.f32 %v4107_v0, %v904_v59  ;;  %v1610_v19 = vpop.permute.xlu1 %1609  ;;  %2643 = vmatmul.msk.f32.gmra.mxu0 %vm739_vm0, %v720_v17 }
 0x278   :  { %v1655_v41 = vmul.f32 %v3865_v49, %v1610_v19  ;;  %2732 = vmatmul.msk.f32.gmra.mxu3 %vm739_vm0, %v2175_v56  ;;  %v654_v3 = vadd.f32 %v622_v29, %v460_v53  ;;  %v4653_v56 = vld [vmem:[#allocation19_spill] sm:$0xff] }
 0x279   :  { %v966_v46 = vmax.f32 %v905_v6, 0.0  ;;  %v267_v59 = vmul.f32 %v3873_v31, %v4653_v56  ;;  %v2400_v6 = vmax.f32 %v2309_v15, 0.0 }
 0x27a   :  { %v1687_v55 = vadd.f32 %v1655_v41, %v1495_v5  ;;  %v580_v5 = vpop.permute.xlu0 %579  ;;  %v690_v9 = vadd.f32 %v3894_v2, %v654_v3  ;;  %v2306_v3 = vadd.f32 %v4191_v26, %v4086_v60 }
 0x27b   :  { %v4175_v8 = vpop.permute.xlu2 %1617  ;;  %2667 = vmatmul.msk.f32.gmra.mxu1 %vm739_vm0, %v966_v46  ;;  %v623_v46 = vmul.f32 %v3881_v47, %v580_v5 }
 0x27c   :  { %v1879_v45 = vadd.f32 %v1847_v28, %v1687_v55  ;;  %v1688_v28 = vadd.f32 %v1656_v4, %v1496_v58  ;;  %v2398_v55 = vmax.f32 %v2303_v24, 0.0  ;;  %v1657_v60 = vmul.f32 %v3865_v49, %v4175_v8 }
 0x27e   :  { %v1911_v42 = vadd.f32 %v3894_v2, %v1879_v45  ;;  %v2402_v45 = vmax.f32 %v2315_v11, 0.0  ;;  %v2430_v33 = vmax.f32 %v2398_v55, %v2400_v6  ;;  %v2324_v6 = vadd.f32 %v4191_v26, %v4169_v13 }
 0x280   :  { %v1943_v27 = vmax.f32 %v1911_v42, 0.0  ;;  %v572_v1 = vpop.permute.xlu1 %571  ;;  %v4216_v42 = vpop.f32.mrf.mxu1  ;;  %v2432_v32 = vmax.f32 %v2430_v33, %v2402_v45 }
 0x281   :  { %v621_v36 = vmul.f32 %v3881_v47, %v572_v1  ;;  %v2406_v1 = vmax.f32 %v2327_v16, 0.0 }
 0x282   :  { %2709 = vmatmul.msk.f32.gmra.mxu2 %vm739_vm0, %v1943_v27  ;;  %v722_v27 = vmax.f32 %v690_v9, 0.0  ;;  %v2434_v53 = vmax.f32 %v2432_v32, %v2404_v43 }
 0x283   :  { %v653_v40 = vadd.f32 %v621_v36, %v459_v21  ;;  %v386_v44 = vpop.permute.xlu2 %385 }
 0x284   :  { %v2118_v48 = vpop.f32.mrf.mxu2  ;;  %v429_v14 = vmul.f32 %v3865_v49, %v386_v44  ;;  %v2436_v15 = vmax.f32 %v2434_v53, %v2406_v1 }
 0x285   :  { %v689_v38 = vadd.f32 %v3894_v2, %v653_v40  ;;  %v2119_v18 = vadd.f32 %v4107_v0, %v2118_v48 }
 0x286   :  { %v907_v34 = vpop.f32.mrf.mxu0  ;;  %v461_v23 = vadd.f32 %v429_v14, %v267_v59 }
 0x287   :  { %v721_v30 = vmax.f32 %v689_v38, 0.0  ;;  %v2176_v17 = vmax.f32 %v2119_v18, 0.0  ;;  %v908_v63 = vadd.f32 %v4107_v0, %v907_v34  ;;  %v2312_v18 = vadd.f32 %v4191_v26, %v4119_v52 }
 0x288   :  { %v1806_v19 = vpop.permute.xlu1 %1805  ;;  %v2329_v12 = vpop.f32.mrf.mxu3  ;;  %v655_v21 = vadd.f32 %v623_v46, %v461_v23  ;;  %v1116_v52 = vadd.f32 %v4191_v26, %v4130_v37 }
 0x289   :  { %v967_v41 = vmax.f32 %v908_v63, 0.0  ;;  %v1848_v51 = vmul.f32 %v3881_v47, %v1806_v19  ;;  %2644 = vmatmul.msk.f32.gmra.mxu0 %vm739_vm0, %v721_v30  ;;  %2733 = vmatmul.msk.f32.gmra.mxu3 %vm739_vm0, %v2176_v17  ;;  %v2318_v30 = vadd.f32 %v4191_v26, %v4144_v35  ;;  %v2401_v59 = vmax.f32 %v2312_v18, 0.0 }
 0x28a   :  { %v691_v44 = vadd.f32 %v3894_v2, %v655_v21  ;;  %v2399_v35 = vmax.f32 %v2306_v3, 0.0  ;;  %v1122_v19 = vadd.f32 %v4191_v26, %v4157_v7  ;;  %v2330_v13 = vadd.f32 %v4191_v26, %v2329_v12 }
 0x28b   :  { %v1880_v50 = vadd.f32 %v1848_v51, %v1688_v28  ;;  %2668 = vmatmul.msk.f32.gmra.mxu1 %vm739_vm0, %v967_v41  ;;  %v1133_v48 = vpop.f32.mrf.mxu1  ;;  %v2403_v5 = vmax.f32 %v2318_v30, 0.0  ;;  %v1205_v8 = vmax.f32 %v1116_v52, 0.0  ;;  %v2405_v41 = vmax.f32 %v2324_v6, 0.0  ;;  %v1622_v23 = vpop.permute.xlu2 %1621 }
 0x28c   :  { %v723_v14 = vmax.f32 %v691_v44, 0.0  ;;  %v2431_v28 = vmax.f32 %v2399_v35, %v2401_v59  ;;  %v1128_v51 = vadd.f32 %v4191_v26, %v4185_v20  ;;  %v1113_v7 = vadd.f32 %v4191_v26, %v4115_v62  ;;  %v1814_v44 = vpop.permute.xlu0 %1813 }
 0x28d   :  { %v1912_v57 = vadd.f32 %v3894_v2, %v1880_v50  ;;  %v1207_v45 = vmax.f32 %v1122_v19, 0.0  ;;  %v2407_v16 = vmax.f32 %v2330_v13, 0.0  ;;  %v1134_v12 = vadd.f32 %v4191_v26, %v1133_v48  ;;  %v4293_v13 = vld [vmem:[%s4593_s3] ss:$0 sm:$0xff] }
 0x28e   :  { %v2433_v9 = vmax.f32 %v2431_v28, %v2403_v5  ;;  %v1107_v50 = vadd.f32 %v4191_v26, %v4079_v54  ;;  %v1119_v20 = vadd.f32 %v4191_v26, %v4148_v39  ;;  %v1209_v32 = vmax.f32 %v1128_v51, 0.0  ;;  %v4267_v54 = vld [vmem:[%s4592_s2 + $0x1] ss:$0 sm:$0xff] }
 0x28f   :  { %v1944_v36 = vmax.f32 %v1912_v57, 0.0  ;;  %v1204_v1 = vmax.f32 %v1113_v7, 0.0  ;;  %v1658_v39 = vmul.f32 %v4267_v54, %v1622_v23  ;;  %v1131_v3 = vadd.f32 %v4191_v26, %v4216_v42  ;;  %v4654_v7 = vld [vmem:[#allocation12_spill] sm:$0xff] }
 0x290   :  { %v2332_v29 = vpop.f32.mrf.mxu3  ;;  %v2435_v57 = vmax.f32 %v2433_v9, %v2405_v41  ;;  %v1206_v48 = vmax.f32 %v1119_v20, 0.0 }
 0x291   :  { %v1456_v40 = vpop.permute.xlu1 %1455  ;;  %2645 = vmatmul.msk.f32.gmra.mxu0 %vm739_vm0, %v722_v27  ;;  %2710 = vmatmul.msk.f32.gmra.mxu2 %vm739_vm0, %v1944_v36  ;;  %v2333_v10 = vadd.f32 %v4191_v26, %v2332_v29  ;;  %v1125_v36 = vadd.f32 %v4191_v26, %v4173_v61  ;;  %v1210_v42 = vmax.f32 %v1131_v3, 0.0 }
 0x292   :  { %v1497_v17 = vmul.f32 %v3873_v31, %v1456_v40  ;;  %v1110_v31 = vadd.f32 %v4191_v26, %v4094_v25  ;;  %v2437_v29 = vmax.f32 %v2435_v57, %v2407_v16 }
 0x293   :  { %v2408_v58 = vmax.f32 %v2333_v10, 0.0  ;;  %v1136_v46 = vpop.f32.mrf.mxu1  ;;  %v4273_v10 = vld [vmem:[%s4592_s2] ss:$0 sm:$0xff] }
 0x294   :  { %v2121_v38 = vpop.f32.mrf.mxu2  ;;  %v1689_v22 = vadd.f32 %v1657_v60, %v1497_v17  ;;  %v1203_v55 = vmax.f32 %v1110_v31, 0.0  ;;  %v1137_v60 = vadd.f32 %v4191_v26, %v1136_v46 }
 0x295   :  { %v4226_v4 = vmax.f32 %v2436_v15, %v2408_v58  ;;  %v2122_v24 = vadd.f32 %v4107_v0, %v2121_v38  ;;  %v910_v11 = vpop.f32.mrf.mxu0  ;;  %v1202_v15 = vmax.f32 %v1107_v50, 0.0 }
 0x296   :  { %v911_v34 = vadd.f32 %v4107_v0, %v910_v11  ;;  %v1235_v33 = vmax.f32 %v1203_v55, %v1205_v8  ;;  %v1212_v46 = vmax.f32 %v1137_v60, 0.0 }
 0x297   :  { %v2177_v63 = vmax.f32 %v2122_v24, 0.0  ;;  %v4281_v24 = vld [vmem:[%s4592_s2 + $0x2] ss:$0 sm:$0xff]  ;;  %v1234_v17 = vmax.f32 %v1202_v15, %v1204_v1 }
 0x298   :  { %v968_v56 = vmax.f32 %v911_v34, 0.0  ;;  %v1237_v21 = vmax.f32 %v1235_v33, %v1207_v45  ;;  %v1850_v11 = vmul.f32 %v4281_v24, %v1814_v44  ;;  %v268_v45 = vmul.f32 %v4273_v10, %v4654_v7 }
 0x299   :  { %2646 = vmatmul.msk.f32.gmra.mxu0 %vm739_vm0, %v723_v14  ;;  %2734 = vmatmul.msk.f32.gmra.mxu3 %vm739_vm0, %v2177_v63  ;;  %v1208_v63 = vmax.f32 %v1125_v36, 0.0 }
 0x29a   :  { %v1810_v37 = vpop.permute.xlu1 %1809  ;;  %2669 = vmatmul.msk.f32.gmra.mxu1 %vm739_vm0, %v968_v56  ;;  %v1239_v58 = vmax.f32 %v1237_v21, %v1209_v32  ;;  %v584_v56 = vpop.permute.xlu2 %583 }
 0x29b   :  { %v1849_v49 = vmul.f32 %v3881_v47, %v1810_v37  ;;  %v1236_v37 = vmax.f32 %v1234_v17, %v1206_v48  ;;  %v624_v9 = vmul.f32 %v4281_v24, %v584_v56  ;;  %v1466_v21 = vpop.permute.xlu0 %1465 }
 0x29d   :  { %v1881_v25 = vadd.f32 %v1849_v49, %v1689_v22  ;;  %v1238_v51 = vmax.f32 %v1236_v37, %v1208_v63 }
 0x29f   :  { %v1913_v47 = vadd.f32 %v3894_v2, %v1881_v25  ;;  %v1211_v2 = vmax.f32 %v1134_v12, 0.0 }
 0x2a0   :  { %v2335_v43 = vpop.f32.mrf.mxu3 }
 0x2a1   :  { %v1945_v27 = vmax.f32 %v1913_v47, 0.0  ;;  %v2336_v62 = vadd.f32 %v4191_v26, %v2335_v43  ;;  %v1241_v52 = vmax.f32 %v1239_v58, %v1211_v2  ;;  %v1240_v47 = vmax.f32 %v1238_v51, %v1210_v42 }
 0x2a2   :  { %v1499_v2 = vmul.f32 %v4273_v10, %v1466_v21 }
 0x2a3   :  { %v2409_v53 = vmax.f32 %v2336_v62, 0.0  ;;  %v1461_v40 = vpop.permute.xlu1 %1460  ;;  %2711 = vmatmul.msk.f32.gmra.mxu2 %vm739_vm0, %v1945_v27  ;;  %v1242_v57 = vmax.f32 %v1240_v47, %v1212_v46  ;;  %v1818_v62 = vpop.permute.xlu2 %1817  ;;  %v4656_v46 = vld [vmem:[#allocation21_spill] sm:$0xff] }
 0x2a4   :  { %v1498_v61 = vmul.f32 %v4273_v10, %v1461_v40  ;;  %v1851_v44 = vmul.f32 %v4281_v24, %v1818_v62 }
 0x2a5   :  { %v4276_v38 = vmax.f32 %v2437_v29, %v2409_v53  ;;  %v1139_v18 = vpop.f32.mrf.mxu1 }
 0x2a6   :  { %v1690_v34 = vadd.f32 %v1658_v39, %v1498_v61  ;;  %v1140_v30 = vadd.f32 %v4191_v26, %v1139_v18  ;;  %v2124_v14 = vpop.f32.mrf.mxu2 }
 0x2a7   :  { %v2125_v59 = vadd.f32 %v4107_v0, %v2124_v14  ;;  %v913_v6 = vpop.f32.mrf.mxu0 }
 0x2a8   :  { %v1882_v35 = vadd.f32 %v1850_v11, %v1690_v34  ;;  %v1213_v31 = vmax.f32 %v1140_v30, 0.0  ;;  %v914_v19 = vadd.f32 %v4107_v0, %v913_v6 }
 0x2a9   :  { %v2178_v5 = vmax.f32 %v2125_v59, 0.0 }
 0x2aa   :  { %v1914_v22 = vadd.f32 %v4293_v13, %v1882_v35  ;;  %v4296_v49 = vmax.f32 %v1241_v52, %v1213_v31  ;;  %v969_v8 = vmax.f32 %v914_v19, 0.0  ;;  %v2338_v28 = vpop.f32.mrf.mxu3  ;;  %v4655_v52 = vld [vmem:[#allocation22_spill] sm:$0xff]  ;;  %v398_v35 = vpop.permute.xlu0 %397 }
 0x2ab   :  { %v2339_v41 = vadd.f32 %v4191_v26, %v2338_v28  ;;  %2735 = vmatmul.msk.f32.gmra.mxu3 %vm739_vm0, %v2178_v5  ;;  %v588_v30 = vpop.permute.xlu2 %587  ;;  %v269_v56 = vmul.f32 %v4273_v10, %v4655_v52  ;;  %v432_v28 = vmul.f32 %v4267_v54, %v398_v35 }
 0x2ac   :  { %v1946_v25 = vmax.f32 %v1914_v22, 0.0  ;;  %v390_v55 = vpop.permute.xlu1 %389  ;;  %2670 = vmatmul.msk.f32.gmra.mxu1 %vm739_vm0, %v969_v8  ;;  %v625_v31 = vmul.f32 %v4281_v24, %v588_v30 }
 0x2ad   :  { %v2410_v16 = vmax.f32 %v2339_v41, 0.0  ;;  %v430_v12 = vmul.f32 %v4267_v54, %v390_v55  ;;  %v1142_v23 = vpop.f32.mrf.mxu1 }
 0x2ae   :  { %v1143_v50 = vadd.f32 %v4191_v26, %v1142_v23  ;;  %2712 = vmatmul.msk.f32.gmra.mxu2 %vm739_vm0, %v1946_v25  ;;  %v270_v25 = vmul.f32 %v4273_v10, %v4656_v46 }
 0x2af   :  { %v4308_v33 = vmax.f32 %v4226_v4, %v2410_v16  ;;  %v462_v20 = vadd.f32 %v430_v12, %v268_v45  ;;  %v916_v43 = vpop.f32.mrf.mxu0 }
 0x2b0   :  { %v1214_v32 = vmax.f32 %v1143_v50, 0.0  ;;  %v917_v27 = vadd.f32 %v4107_v0, %v916_v43  ;;  %v464_v16 = vadd.f32 %v432_v28, %v270_v25 }
 0x2b1   :  { %v656_v1 = vadd.f32 %v624_v9, %v462_v20 }
 0x2b2   :  { %v4311_v36 = vmax.f32 %v1242_v57, %v1214_v32  ;;  %v970_v29 = vmax.f32 %v917_v27, 0.0  ;;  %v2487_v32 = vld [vmem:[%s4598_s8 + $0x78] sm:$0xff] }
 0x2b3   :  { %v692_v53 = vadd.f32 %v4293_v13, %v656_v1  ;;  %2533 = vmatpush.msrb.mxu1 %v2487_v32 }
 0x2b4   :  { %v1626_v40 = vpop.permute.xlu1 %1625  ;;  %2671 = vmatmul.msk.f32.gmra.mxu1 %vm739_vm0, %v970_v29 }
 0x2b5   :  { %v724_v4 = vmax.f32 %v692_v53, 0.0  ;;  %v1659_v39 = vmul.f32 %v4267_v54, %v1626_v40  ;;  %v2127_v61 = vpop.f32.mrf.mxu2 }
 0x2b6   :  { %v2128_v15 = vadd.f32 %v4107_v0, %v2127_v61 }
 0x2b7   :  { %v1691_v48 = vadd.f32 %v1659_v39, %v1499_v2  ;;  %v919_v58 = vpop.f32.mrf.mxu0  ;;  %2647 = vmatmul.msk.f32.gmra.mxu0 %vm739_vm0, %v724_v4  ;;  %v2502_v4 = vld [vmem:[%s4599_s9 + $0x70] sm:$0xff] }
 0x2b8   :  { %v2179_v18 = vmax.f32 %v2128_v15, 0.0  ;;  %v920_v11 = vadd.f32 %v4107_v0, %v919_v58 }
 0x2b9   :  { %v1883_v3 = vadd.f32 %v1851_v44, %v1691_v48 }
 0x2ba   :  { %v971_v34 = vmax.f32 %v920_v11, 0.0  ;;  %2736 = vmatmul.msk.f32.gmra.mxu3 %vm739_vm0, %v2179_v18 }
 0x2bb   :  { %v1915_v14 = vadd.f32 %v4293_v13, %v1883_v3  ;;  %v2501_v3 = vld [vmem:[%s4599_s9 + $0x68] sm:$0xff] }
 0x2bc   :  { %v394_v17 = vpop.permute.xlu1 %393  ;;  %2672 = vmatmul.msk.f32.gmra.mxu1 %vm739_vm0, %v971_v34  ;;  %v2341_v63 = vpop.f32.mrf.mxu3  ;;  %v2485_v34 = vld [vmem:[%s4598_s8 + $0x68] sm:$0xff] }
 0x2bd   :  { %v1947_v59 = vmax.f32 %v1915_v14, 0.0  ;;  %v431_v6 = vmul.f32 %v4267_v54, %v394_v17  ;;  %v2342_v60 = vadd.f32 %v4191_v26, %v2341_v63 }
 0x2bf   :  { %v463_v19 = vadd.f32 %v431_v6, %v269_v56  ;;  %v2411_v37 = vmax.f32 %v2342_v60, 0.0  ;;  %2713 = vmatmul.msk.f32.gmra.mxu2 %vm739_vm0, %v1947_v59 }
 0x2c0   :  { %v1145_v5 = vpop.f32.mrf.mxu1 }
 0x2c1   :  { %v657_v42 = vadd.f32 %v625_v31, %v463_v19  ;;  %v2441_v22 = vmax.f32 %v4276_v38, %v2411_v37  ;;  %v1146_v8 = vadd.f32 %v4191_v26, %v1145_v5 }
 0x2c3   :  { %v693_v41 = vadd.f32 %v4293_v13, %v657_v42  ;;  %v1215_v51 = vmax.f32 %v1146_v8, 0.0  ;;  %v2484_v8 = vld [vmem:[%s4598_s8 + $0x60] sm:$0xff] }
 0x2c5   :  { %v725_v55 = vmax.f32 %v693_v41, 0.0  ;;  %v1245_v7 = vmax.f32 %v4296_v49, %v1215_v51  ;;  %v592_v45 = vpop.permute.xlu1 %591  ;;  %v2344_v9 = vpop.f32.mrf.mxu3 }
 0x2c6   :  { %v626_v12 = vmul.f32 %v4281_v24, %v592_v45  ;;  %v2345_v38 = vadd.f32 %v4191_v26, %v2344_v9  ;;  %v2503_v24 = vld [vmem:[%s4599_s9 + $0x78] sm:$0xff] }
 0x2c7   :  { %2648 = vmatmul.msk.f32.gmra.mxu0 %vm739_vm0, %v725_v55  ;;  %v2130_v23 = vpop.f32.mrf.mxu2  ;;  %v2499_v9 = vld [vmem:[%s4599_s9 + $0x58] sm:$0xff] }
 0x2c8   :  { %v658_v54 = vadd.f32 %v626_v12, %v464_v16  ;;  %v2412_v47 = vmax.f32 %v2345_v38, 0.0  ;;  %v2131_v50 = vadd.f32 %v4107_v0, %v2130_v23  ;;  %v1148_v20 = vpop.f32.mrf.mxu1  ;;  %2509 = vmatpush.msrb.mxu0 %v2503_v24  ;;  %v2483_v16 = vld [vmem:[%s4598_s8 + $0x58] sm:$0xff] }
 0x2c9   :  { %v1149_v10 = vadd.f32 %v4191_v26, %v1148_v20 }
 0x2ca   :  { %v694_v43 = vadd.f32 %v4293_v13, %v658_v54  ;;  %v2442_v49 = vmax.f32 %v4308_v33, %v2412_v47  ;;  %v2180_v57 = vmax.f32 %v2131_v50, 0.0  ;;  %2510 = vmatpush.msrb.mxu0 %v2502_v4 }
 0x2cb   :  { %v1216_v27 = vmax.f32 %v1149_v10, 0.0 }
 0x2cc   :  { %v726_v62 = vmax.f32 %v694_v43, 0.0  ;;  %2737 = vmatmul.msk.f32.gmra.mxu3 %vm739_vm0, %v2180_v57  ;;  %2511 = vmatpush.msrb.mxu0 %v2501_v3 }
 0x2cd   :  { %v1246_v1 = vmax.f32 %v4311_v36, %v1216_v27  ;;  %v2486_v36 = vld [vmem:[%s4598_s8 + $0x70] sm:$0xff] }
 0x2ce   :  { %2534 = vmatpush.msrb.mxu1 %v2486_v36 }
 0x2cf   :  { %2649 = vmatmul.msk.f32.gmra.mxu0 %vm739_vm0, %v726_v62 }
 0x2d0   :  { %2535 = vmatpush.msrb.mxu1 %v2485_v34 }
 0x2d2   :  { %v2133_v13 = vpop.f32.mrf.mxu2  ;;  %2536 = vmatpush.msrb.mxu1 %v2484_v8 }
 0x2d3   :  { %v2134_v33 = vadd.f32 %v4107_v0, %v2133_v13 }
 0x2d4   :  { %2537 = vmatpush.msrb.mxu1 %v2483_v16  ;;  %v2496_v16 = vld [vmem:[%s4599_s9 + $0x40] sm:$0xff] }
 0x2d5   :  { %v2181_v21 = vmax.f32 %v2134_v33, 0.0  ;;  %v922_v29 = vpop.f32.mrf.mxu0  ;;  %v2347_v2 = vpop.f32.mrf.mxu3 }
 0x2d6   :  { %v923_v53 = vadd.f32 %v4107_v0, %v922_v29  ;;  %v2348_v40 = vadd.f32 %v4191_v26, %v2347_v2 }
 0x2d7   :  { %2738 = vmatmul.msk.f32.gmra.mxu3 %vm739_vm0, %v2181_v21 }
 0x2d8   :  { %v972_v39 = vmax.f32 %v923_v53, 0.0  ;;  %v2413_v61 = vmax.f32 %v2348_v40, 0.0 }
 0x2da   :  { %v2443_v15 = vmax.f32 %v2441_v22, %v2413_v61  ;;  %2673 = vmatmul.msk.f32.gmra.mxu1 %vm739_vm0, %v972_v39  ;;  %v2500_v22 = vld [vmem:[%s4599_s9 + $0x60] sm:$0xff] }
 0x2db   :  { %v1151_v44 = vpop.f32.mrf.mxu1  ;;  %2512 = vmatpush.msrb.mxu0 %v2500_v22 }
 0x2dc   :  { %v4364_v48 = vmax.f32 %v2442_v49, %v2443_v15  ;;  %v1152_v58 = vadd.f32 %v4191_v26, %v1151_v44  ;;  %v2498_v44 = vld [vmem:[%s4599_s9 + $0x50] sm:$0xff] }
 0x2dd   :  { %2513 = vmatpush.msrb.mxu0 %v2499_v9 }
 0x2de   :  { %v1217_v18 = vmax.f32 %v1152_v58, 0.0  ;;  %v2482_v58 = vld [vmem:[%s4598_s8 + $0x50] sm:$0xff] }
 0x2df   :  { %v2350_v6 = vpop.f32.mrf.mxu3  ;;  %2514 = vmatpush.msrb.mxu0 %v2498_v44  ;;  %2538 = vmatpush.msrb.mxu1 %v2482_v58  ;;  %v2572_v44 = vld [vmem:[%s4601_s11 + $0x68] sm:$0xff]  ;;  %v2492_v58 = vld [vmem:[%s4599_s9 + $0x20] sm:$0xff] }
 0x2e0   :  { %v1247_v11 = vmax.f32 %v1245_v7, %v1217_v18  ;;  %v2351_v41 = vadd.f32 %v4191_v26, %v2350_v6 }
 0x2e2   :  { %v4373_v30 = vmax.f32 %v1246_v1, %v1247_v11  ;;  %v2414_v25 = vmax.f32 %v2351_v41, 0.0 }
 0x2e3   :  { %v2136_v14 = vpop.f32.mrf.mxu2  ;;  %v1154_v28 = vpop.f32.mrf.mxu1 }
 0x2e4   :  { %v2137_v17 = vadd.f32 %v4107_v0, %v2136_v14  ;;  %v1155_v54 = vadd.f32 %v4191_v26, %v1154_v28 }
 0x2e5   :  { %v925_v63 = vpop.f32.mrf.mxu0 }
 0x2e6   :  { %v2182_v52 = vmax.f32 %v2137_v17, 0.0  ;;  %v926_v56 = vadd.f32 %v4107_v0, %v925_v63  ;;  %v1218_v49 = vmax.f32 %v1155_v54, 0.0 }
 0x2e8   :  { %v973_v59 = vmax.f32 %v926_v56, 0.0  ;;  %2739 = vmatmul.msk.f32.gmra.mxu3 %vm739_vm0, %v2182_v52 }
 0x2ea   :  { %2674 = vmatmul.msk.f32.gmra.mxu1 %vm739_vm0, %v973_v59 }
 0x2f2   :  { %v2353_v60 = vpop.f32.mrf.mxu3 }
 0x2f3   :  { %v2139_v35 = vpop.f32.mrf.mxu2  ;;  %v2354_v57 = vadd.f32 %v4191_v26, %v2353_v60  ;;  %v2497_v60 = vld [vmem:[%s4599_s9 + $0x48] sm:$0xff] }
 0x2f4   :  { %v2140_v31 = vadd.f32 %v4107_v0, %v2139_v35  ;;  %v928_v19 = vpop.f32.mrf.mxu0  ;;  %v2481_v35 = vld [vmem:[%s4598_s8 + $0x48] sm:$0xff]  ;;  %2515 = vmatpush.msrb.mxu0 %v2497_v60 }
 0x2f5   :  { %v929_v37 = vadd.f32 %v4107_v0, %v928_v19  ;;  %v2415_v13 = vmax.f32 %v2354_v57, 0.0  ;;  %2539 = vmatpush.msrb.mxu1 %v2481_v35  ;;  %v2495_v57 = vld [vmem:[%s4599_s9 + $0x38] sm:$0xff] }
 0x2f6   :  { %v2183_v5 = vmax.f32 %v2140_v31, 0.0  ;;  %2516 = vmatpush.msrb.mxu0 %v2496_v16 }
 0x2f7   :  { %v974_v42 = vmax.f32 %v929_v37, 0.0 }
 0x2f8   :  { %2740 = vmatmul.msk.f32.gmra.mxu3 %vm739_vm0, %v2183_v5  ;;  %v1157_v7 = vpop.f32.mrf.mxu1  ;;  %2517 = vmatpush.msrb.mxu0 %v2495_v57 }
 0x2f9   :  { %2675 = vmatmul.msk.f32.gmra.mxu1 %vm739_vm0, %v974_v42  ;;  %v1158_v4 = vadd.f32 %v4191_v26, %v1157_v7 }
 0x2fb   :  { %v2356_v51 = vpop.f32.mrf.mxu3  ;;  %v1219_v3 = vmax.f32 %v1158_v4, 0.0 }
 0x2fc   :  { %v2357_v46 = vadd.f32 %v4191_v26, %v2356_v51 }
 0x2fe   :  { %v2416_v55 = vmax.f32 %v2357_v46, 0.0 }
 0x300   :  { %v2451_v45 = vmax.f32 %v2414_v25, %v2416_v55 }
 0x305   :  { %v2142_v12 = vpop.f32.mrf.mxu2 }
 0x306   :  { %v2143_v38 = vadd.f32 %v4107_v0, %v2142_v12  ;;  %v931_v23 = vpop.f32.mrf.mxu0  ;;  %v2480_v12 = vld [vmem:[%s4598_s8 + $0x40] sm:$0xff] }
 0x307   :  { %v932_v47 = vadd.f32 %v4107_v0, %v931_v23  ;;  %2540 = vmatpush.msrb.mxu1 %v2480_v12 }
 0x308   :  { %v2184_v50 = vmax.f32 %v2143_v38, 0.0  ;;  %v1160_v20 = vpop.f32.mrf.mxu1 }
 0x309   :  { %v975_v10 = vmax.f32 %v932_v47, 0.0  ;;  %v1161_v43 = vadd.f32 %v4191_v26, %v1160_v20 }
 0x30a   :  { %2741 = vmatmul.msk.f32.gmra.mxu3 %vm739_vm0, %v2184_v50 }
 0x30b   :  { %v1220_v24 = vmax.f32 %v1161_v43, 0.0  ;;  %2676 = vmatmul.msk.f32.gmra.mxu1 %vm739_vm0, %v975_v10 }
 0x30c   :  { %v2359_v32 = vpop.f32.mrf.mxu3 }
 0x30d   :  { %v1255_v27 = vmax.f32 %v1218_v49, %v1220_v24  ;;  %v2360_v62 = vadd.f32 %v4191_v26, %v2359_v32  ;;  %v2479_v24 = vld [vmem:[%s4598_s8 + $0x38] sm:$0xff] }
 0x30e   :  { %v934_v1 = vpop.f32.mrf.mxu0  ;;  %2541 = vmatpush.msrb.mxu1 %v2479_v24 }
 0x30f   :  { %v2417_v33 = vmax.f32 %v2360_v62, 0.0  ;;  %v935_v21 = vadd.f32 %v4107_v0, %v934_v1 }
 0x311   :  { %v2452_v29 = vmax.f32 %v2415_v13, %v2417_v33  ;;  %v976_v2 = vmax.f32 %v935_v21, 0.0 }
 0x313   :  { %2677 = vmatmul.msk.f32.gmra.mxu1 %vm739_vm0, %v976_v2 }
 0x314   :  { %v2145_v53 = vpop.f32.mrf.mxu2 }
 0x315   :  { %v2146_v40 = vadd.f32 %v4107_v0, %v2145_v53  ;;  %v2574_v53 = vld [vmem:[%s4601_s11 + $0x78] sm:$0xff] }
 0x316   :  { %v937_v36 = vpop.f32.mrf.mxu0  ;;  %2579 = vmatpush.msrb.mxu2 %v2574_v53 }
 0x317   :  { %v2185_v39 = vmax.f32 %v2146_v40, 0.0  ;;  %v938_v61 = vadd.f32 %v4107_v0, %v937_v36  ;;  %v1163_v15 = vpop.f32.mrf.mxu1  ;;  %v2494_v36 = vld [vmem:[%s4599_s9 + $0x30] sm:$0xff] }
 0x318   :  { %v1164_v18 = vadd.f32 %v4191_v26, %v1163_v15  ;;  %2518 = vmatpush.msrb.mxu0 %v2494_v36  ;;  %v2477_v15 = vld [vmem:[%s4598_s8 + $0x28] sm:$0xff] }
 0x319   :  { %v977_v11 = vmax.f32 %v938_v61, 0.0  ;;  %2742 = vmatmul.msk.f32.gmra.mxu3 %vm739_vm0, %v2185_v39  ;;  %v2478_v39 = vld [vmem:[%s4598_s8 + $0x30] sm:$0xff]  ;;  %v2564_v36 = vld [vmem:[%s4601_s11 + $0x28] sm:$0xff] }
 0x31a   :  { %v1221_v34 = vmax.f32 %v1164_v18, 0.0  ;;  %2542 = vmatpush.msrb.mxu1 %v2478_v39  ;;  %v2573_v61 = vld [vmem:[%s4601_s11 + $0x70] sm:$0xff]  ;;  %v2476_v18 = vld [vmem:[%s4598_s8 + $0x20] sm:$0xff] }
 0x31b   :  { %2678 = vmatmul.msk.f32.gmra.mxu1 %vm739_vm0, %v977_v11  ;;  %2580 = vmatpush.msrb.mxu2 %v2573_v61  ;;  %v2571_v11 = vld [vmem:[%s4601_s11 + $0x60] sm:$0xff] }
 0x31c   :  { %v1256_v14 = vmax.f32 %v1219_v3, %v1221_v34  ;;  %v2362_v17 = vpop.f32.mrf.mxu3  ;;  %2543 = vmatpush.msrb.mxu1 %v2477_v15  ;;  %v2491_v3 = vld [vmem:[%s4599_s9 + $0x18] sm:$0xff] }
 0x31d   :  { %v2363_v63 = vadd.f32 %v4191_v26, %v2362_v17  ;;  %2581 = vmatpush.msrb.mxu2 %v2572_v44  ;;  %v2475_v34 = vld [vmem:[%s4598_s8 + $0x18] sm:$0xff] }
 0x31e   :  { %2544 = vmatpush.msrb.mxu1 %v2476_v18 }
 0x31f   :  { %v2418_v52 = vmax.f32 %v2363_v63, 0.0  ;;  %2582 = vmatpush.msrb.mxu2 %v2571_v11 }
 0x320   :  { %2545 = vmatpush.msrb.mxu1 %v2475_v34 }
 0x321   :  { %v2453_v56 = vmax.f32 %v2451_v45, %v2418_v52 }
 0x326   :  { %v2148_v59 = vpop.f32.mrf.mxu2 }
 0x327   :  { %v2149_v6 = vadd.f32 %v4107_v0, %v2148_v59  ;;  %v2490_v59 = vld [vmem:[%s4599_s9 + $0x10] sm:$0xff] }
 0x329   :  { %v2186_v31 = vmax.f32 %v2149_v6, 0.0  ;;  %v1166_v19 = vpop.f32.mrf.mxu1  ;;  %v2474_v6 = vld [vmem:[%s4598_s8 + $0x10] sm:$0xff] }
 0x32a   :  { %v1167_v37 = vadd.f32 %v4191_v26, %v1166_v19  ;;  %2546 = vmatpush.msrb.mxu1 %v2474_v6  ;;  %v2489_v19 = vld [vmem:[%s4599_s9 + $0x8] sm:$0xff] }
 0x32b   :  { %2743 = vmatmul.msk.f32.gmra.mxu3 %vm739_vm0, %v2186_v31  ;;  %v2569_v31 = vld [vmem:[%s4601_s11 + $0x50] sm:$0xff] }
 0x32c   :  { %v1222_v5 = vmax.f32 %v1167_v37, 0.0  ;;  %v2473_v37 = vld [vmem:[%s4598_s8 + $0x8] sm:$0xff] }
 0x32d   :  { %2547 = vmatpush.msrb.mxu1 %v2473_v37 }
 0x32e   :  { %v1257_v42 = vmax.f32 %v1255_v27, %v1222_v5  ;;  %v2365_v22 = vpop.f32.mrf.mxu3 }
 0x32f   :  { %v2366_v8 = vadd.f32 %v4191_v26, %v2365_v22 }
 0x331   :  { %v2419_v28 = vmax.f32 %v2366_v8, 0.0  ;;  %v1169_v41 = vpop.f32.mrf.mxu1  ;;  %v2151_v51 = vpop.f32.mrf.mxu2  ;;  %v2568_v8 = vld [vmem:[%s4601_s11 + $0x48] sm:$0xff] }
 0x332   :  { %v1170_v46 = vadd.f32 %v4191_v26, %v1169_v41  ;;  %v2152_v25 = vadd.f32 %v4107_v0, %v2151_v51 }
 0x333   :  { %v4432_v55 = vmax.f32 %v2452_v29, %v2419_v28 }
 0x334   :  { %v1223_v7 = vmax.f32 %v1170_v46, 0.0  ;;  %v2187_v45 = vmax.f32 %v2152_v25, 0.0  ;;  %v940_v9 = vpop.f32.mrf.mxu0  ;;  %v2488_v25 = vld [vmem:[%s4599_s9] sm:$0xff] }
 0x335   :  { %v941_v38 = vadd.f32 %v4107_v0, %v940_v9 }
 0x336   :  { %v4441_v23 = vmax.f32 %v1256_v14, %v1223_v7  ;;  %2744 = vmatmul.msk.f32.gmra.mxu3 %vm739_vm0, %v2187_v45  ;;  %v2570_v14 = vld [vmem:[%s4601_s11 + $0x58] sm:$0xff]  ;;  %v2472_v7 = vld [vmem:[%s4598_s8] sm:$0xff] }
 0x337   :  { %v978_v54 = vmax.f32 %v941_v38, 0.0  ;;  %2583 = vmatpush.msrb.mxu2 %v2570_v14  ;;  %v2567_v45 = vld [vmem:[%s4601_s11 + $0x40] sm:$0xff]  ;;  %2548 = vmatpush.msrb.mxu1 %v2472_v7 }
 0x339   :  { %v1172_v47 = vpop.f32.mrf.mxu1  ;;  %2679 = vmatmul.msk.f32.gmra.mxu1 %vm739_vm0, %v978_v54  ;;  %2584 = vmatpush.msrb.mxu2 %v2569_v31 }
 0x33a   :  { %v1173_v50 = vadd.f32 %v4191_v26, %v1172_v47 }
 0x33b   :  { %2585 = vmatpush.msrb.mxu2 %v2568_v8 }
 0x33c   :  { %v1224_v20 = vmax.f32 %v1173_v50, 0.0 }
 0x33d   :  { %v2368_v10 = vpop.f32.mrf.mxu3  ;;  %2586 = vmatpush.msrb.mxu2 %v2567_v45 }
 0x33e   :  { %v4446_v43 = vmax.f32 %v1257_v42, %v1224_v20  ;;  %v2369_v49 = vadd.f32 %v4191_v26, %v2368_v10  ;;  %v2445_v20 = vrot.slane %v4364_v48, 4 }
 0x340   :  { %v2420_v32 = vmax.f32 %v2369_v49, 0.0  ;;  %v2446_v39 = vmax.f32 %v4364_v48, %v2445_v20 }
 0x342   :  { %v4455_v27 = vmax.f32 %v2453_v56, %v2420_v32  ;;  %v2154_v62 = vpop.f32.mrf.mxu2 }
 0x343   :  { %v2155_v1 = vadd.f32 %v4107_v0, %v2154_v62  ;;  %v2566_v62 = vld [vmem:[%s4601_s11 + $0x38] sm:$0xff] }
 0x344   :  { %v943_v13 = vpop.f32.mrf.mxu0  ;;  %2587 = vmatpush.msrb.mxu2 %v2566_v62 }
 0x345   :  { %v2188_v33 = vmax.f32 %v2155_v1, 0.0  ;;  %v944_v21 = vadd.f32 %v4107_v0, %v943_v13  ;;  %v2565_v1 = vld [vmem:[%s4601_s11 + $0x30] sm:$0xff] }
 0x346   :  { %2588 = vmatpush.msrb.mxu2 %v2565_v1 }
 0x347   :  { %v979_v29 = vmax.f32 %v944_v21, 0.0  ;;  %2745 = vmatmul.msk.f32.gmra.mxu3 %vm739_vm0, %v2188_v33 }
 0x348   :  { %2589 = vmatpush.msrb.mxu2 %v2564_v36 }
 0x349   :  { %2680 = vmatmul.msk.f32.gmra.mxu1 %vm739_vm0, %v979_v29 }
 0x34c   :  { %v946_v2 = vpop.f32.mrf.mxu0 }
 0x34d   :  { %v947_v40 = vadd.f32 %v4107_v0, %v946_v2  ;;  %v2493_v0 = vld [vmem:[%s4599_s9 + $0x28] sm:$0xff] }
 0x34e   :  { %2519 = vmatpush.msrb.mxu0 %v2493_v0 }
 0x34f   :  { %v980_v4 = vmax.f32 %v947_v40, 0.0  ;;  %v2371_v17 = vpop.f32.mrf.mxu3 }
 0x350   :  { %2520 = vmatpush.msrb.mxu0 %v2492_v58  ;;  %v2372_v16 = vadd.f32 %v4191_v26, %v2371_v17 }
 0x351   :  { %2681 = vmatmul.msk.f32.gmra.mxu1 %vm739_vm0, %v980_v4 }
 0x352   :  { %2521 = vmatpush.msrb.mxu0 %v2491_v3  ;;  %v2421_v10 = vmax.f32 %v2372_v16, 0.0  ;;  %v2563_v3 = vld [vmem:[%s4601_s11 + $0x20] sm:$0xff] }
 0x353   :  { %2590 = vmatpush.msrb.mxu2 %v2563_v3  ;;  %v2844_v3 = vld [vmem:[%s4600_s10] ss:$0 sm:$0xff] }
 0x354   :  { %2522 = vmatpush.msrb.mxu0 %v2490_v59  ;;  %v2456_v61 = vmax.f32 %v4432_v55, %v2421_v10  ;;  %v2562_v59 = vld [vmem:[%s4601_s11 + $0x18] sm:$0xff] }
 0x355   :  { %2591 = vmatpush.msrb.mxu2 %v2562_v59 }
 0x356   :  { %2523 = vmatpush.msrb.mxu0 %v2489_v19  ;;  %v1249_v19 = vrot.slane %v4373_v30, 4 }
 0x357   :  { %v1175_v63 = vpop.f32.mrf.mxu1 }
 0x358   :  { %2524 = vmatpush.msrb.mxu0 %v2488_v25  ;;  %v1176_v54 = vadd.f32 %v4191_v26, %v1175_v63 }
 0x35a   :  { %v2374_v52 = vpop.f32.mrf.mxu3  ;;  %v1225_v29 = vmax.f32 %v1176_v54, 0.0  ;;  %v2559_v54 = vld [vmem:[%s4601_s11] sm:$0xff] }
 0x35b   :  { %v2375_v12 = vadd.f32 %v4191_v26, %v2374_v52 }
 0x35c   :  { %v1260_v55 = vmax.f32 %v4441_v23, %v1225_v29 }
 0x35d   :  { %v2422_v57 = vmax.f32 %v2375_v12, 0.0  ;;  %v2447_v12 = vrot.slane %v2446_v39, 2 }
 0x35f   :  { %v2457_v44 = vmax.f32 %v4455_v27, %v2422_v57 }
 0x367   :  { %v1178_v56 = vpop.f32.mrf.mxu1 }
 0x368   :  { %v1179_v24 = vadd.f32 %v4191_v26, %v1178_v56 }
 0x36a   :  { %v1226_v58 = vmax.f32 %v1179_v24, 0.0 }
 0x36b   :  { %v2377_v60 = vpop.f32.mrf.mxu3 }
 0x36c   :  { %v2378_v38 = vadd.f32 %v4191_v26, %v2377_v60  ;;  %v1261_v37 = vmax.f32 %v4446_v43, %v1226_v58 }
 0x36e   :  { %v2423_v13 = vmax.f32 %v2378_v38, 0.0  ;;  %v1250_v38 = vmax.f32 %v4373_v30, %v1249_v19 }
 0x370   :  { %v2458_v34 = vmax.f32 %v2456_v61, %v2423_v13  ;;  %v1251_v62 = vrot.slane %v1250_v38, 2 }
 0x372   :  { %v1252_v30 = vmax.f32 %v1250_v38, %v1251_v62 }
 0x376   :  { %v1181_v35 = vpop.f32.mrf.mxu1 }
 0x377   :  { %v1182_v32 = vadd.f32 %v4191_v26, %v1181_v35 }
 0x379   :  { %v1227_v18 = vmax.f32 %v1182_v32, 0.0  ;;  %v2448_v32 = vmax.f32 %v2446_v39, %v2447_v12 }
 0x37b   :  { %v2380_v5 = vpop.f32.mrf.mxu3  ;;  %v1262_v23 = vmax.f32 %v1260_v55, %v1227_v18 }
 0x37c   :  { %v2381_v47 = vadd.f32 %v4191_v26, %v2380_v5 }
 0x37e   :  { %v2424_v2 = vmax.f32 %v2381_v47, 0.0 }
 0x380   :  { %v2459_v63 = vmax.f32 %v2457_v44, %v2424_v2 }
 0x388   :  { %v1184_v42 = vpop.f32.mrf.mxu1 }
 0x389   :  { %v1185_v53 = vadd.f32 %v4191_v26, %v1184_v42  ;;  %v2561_v42 = vld [vmem:[%s4601_s11 + $0x10] sm:$0xff] }
 0x38a   :  { %2592 = vmatpush.msrb.mxu2 %v2561_v42 }
 0x38b   :  { %v1228_v52 = vmax.f32 %v1185_v53, 0.0  ;;  %v2449_v53 = vrot.slane %v2448_v32, 1 }
 0x38d   :  { %v2383_v22 = vpop.f32.mrf.mxu3  ;;  %v2450_v61 = vmax.f32 %v2448_v32, %v2449_v53 }
 0x38e   :  { %v2384_v49 = vadd.f32 %v4191_v26, %v2383_v22 }
 0x390   :  { %v1187_v28 = vpop.f32.mrf.mxu1  ;;  %v2425_v0 = vmax.f32 %v2384_v49, 0.0 }
 0x391   :  { %v1188_v40 = vadd.f32 %v4191_v26, %v1187_v28 }
 0x392   :  { %v2460_v6 = vmax.f32 %v2458_v34, %v2425_v0 }
 0x393   :  { %v1229_v56 = vmax.f32 %v1188_v40, 0.0 }
 0x398   :  { %v1190_v51 = vpop.f32.mrf.mxu1 }
 0x399   :  { %v1191_v11 = vadd.f32 %v4191_v26, %v1190_v51  ;;  %v1263_v51 = vmax.f32 %v1261_v37, %v1228_v52 }
 0x39b   :  { %v1230_v5 = vmax.f32 %v1191_v11, 0.0 }
 0x39c   :  { %v2386_v41 = vpop.f32.mrf.mxu3 }
 0x39d   :  { %v2387_v33 = vadd.f32 %v4191_v26, %v2386_v41  ;;  %v1265_v47 = vmax.f32 %v1263_v51, %v1230_v5 }
 0x39f   :  { %v2426_v14 = vmax.f32 %v2387_v33, 0.0 }
 0x3a1   :  { %v2461_v22 = vmax.f32 %v2459_v63, %v2426_v14  ;;  %v2845_v63 = vld [vmem:[%s4602_s12] ss:$0 sm:$0xff] }
 0x3ae   :  { %v2389_v46 = vpop.f32.mrf.mxu3 }
 0x3af   :  { %v2390_v21 = vadd.f32 %v4191_v26, %v2389_v46  ;;  %v1264_v46 = vmax.f32 %v1262_v23, %v1229_v56 }
 0x3b1   :  { %v2427_v17 = vmax.f32 %v2390_v21, 0.0 }
 0x3b3   :  { %v2462_v8 = vmax.f32 %v2460_v6, %v2427_v17 }
 0x3b6   :  { %v1193_v9 = vpop.f32.mrf.mxu1 }
 0x3b7   :  { %v1194_v48 = vadd.f32 %v4191_v26, %v1193_v9  ;;  %v2872_v9 = vld [vmem:[%s4597_s7] ss:$0 sm:$0xff] }
 0x3b9   :  { %v2392_v50 = vpop.f32.mrf.mxu3  ;;  %v1231_v28 = vmax.f32 %v1194_v48, 0.0 }
 0x3ba   :  { %v2393_v15 = vadd.f32 %v4191_v26, %v2392_v50 }
 0x3bb   :  { %v1266_v50 = vmax.f32 %v1264_v46, %v1231_v28 }
 0x3bc   :  { %v2428_v60 = vmax.f32 %v2393_v15, 0.0  ;;  %v1253_v15 = vrot.slane %v1252_v30, 1 }
 0x3be   :  { %v2463_v7 = vmax.f32 %v2461_v22, %v2428_v60  ;;  %v1254_v39 = vmax.f32 %v1252_v30, %v1253_v15 }
 0x3c6   :  { %v1196_v4 = vpop.f32.mrf.mxu1 }
 0x3c7   :  { %v1197_v35 = vadd.f32 %v4191_v26, %v1196_v4 }
 0x3c9   :  { %v1232_v43 = vmax.f32 %v1197_v35, 0.0 }
 0x3ca   :  { %v2395_v27 = vpop.f32.mrf.mxu3 }
 0x3cb   :  { %v2396_v31 = vadd.f32 %v4191_v26, %v2395_v27  ;;  %v2560_v26 = vld [vmem:[%s4601_s11 + $0x8] sm:$0xff]  ;;  %v1267_v49 = vmax.f32 %v1265_v47, %v1232_v43 }
 0x3cc   :  { %2593 = vmatpush.msrb.mxu2 %v2560_v26 }
 0x3cd   :  { %v2429_v41 = vmax.f32 %v2396_v31, 0.0 }
 0x3ce   :  { %v1199_v25 = vpop.f32.mrf.mxu1  ;;  %2594 = vmatpush.msrb.mxu2 %v2559_v54 }
 0x3cf   :  { %v2464_v45 = vmax.f32 %v2462_v8, %v2429_v41  ;;  %v1200_v16 = vadd.f32 %v2872_v9, %v1199_v25 }
 0x3d1   :  { %v2465_v20 = vmax.f32 %v2463_v7, %v2464_v45  ;;  %v1233_v10 = vmax.f32 %v1200_v16, 0.0 }
 0x3d3   :  { %v2466_v57 = vrot.slane %v2465_v20, 4  ;;  %v1268_v24 = vmax.f32 %v1266_v50, %v1233_v10 }
 0x3d5   :  { %v2467_v1 = vmax.f32 %v2465_v20, %v2466_v57  ;;  %v1269_v13 = vmax.f32 %v1267_v49, %v1268_v24 }
 0x3d7   :  { %v2468_v33 = vrot.slane %v2467_v1, 2  ;;  %v1270_v21 = vrot.slane %v1269_v13, 4 }
 0x3d9   :  { %v2469_v29 = vmax.f32 %v2467_v1, %v2468_v33  ;;  %v1271_v2 = vmax.f32 %v1269_v13, %v1270_v21 }
 0x3db   :  { %v1272_v40 = vrot.slane %v1271_v2, 2  ;;  %v2470_v4 = vrot.slane %v2469_v29, 1 }
 0x3dd   :  { %v1273_v36 = vmax.f32 %v1271_v2, %v1272_v40  ;;  %v2471_v0 = vmax.f32 %v2469_v29, %v2470_v4 }
 0x3df   :  { %v2507_v44 = vsel %vm2506_vm1, %v2471_v0, %v2450_v61  ;;  %v1274_v58 = vrot.slane %v1273_v36, 1 }
 0x3e0   :  { %2525 = vmatmul.f32.vlgmr.msrb.gmra.mxu0 %v2507_v44 }
 0x3e1   :  { %v1275_v18 = vmax.f32 %v1273_v36, %v1274_v58 }
 0x3e3   :  { %v2531_v11 = vsel %vm2506_vm1, %v1275_v18, %v1254_v39 }
 0x3e4   :  { %2549 = vmatmul.f32.vlgmr.msrb.gmra.mxu1 %v2531_v11 }
 0x45d   :  { %v2526_v34 = vpop.f32.mrf.mxu0 }
 0x461   :  { %v2550_v14 = vpop.f32.mrf.mxu1 }
 0x462   :  { %v2551_v17 = vadd.f32 %v2550_v14, %v2526_v34 }
 0x464   :  { %v2557_v48 = vadd.f32 %v2844_v3, %v2551_v17 }
 0x466   :  { %v2558_v55 = vmax.f32 %v2557_v48, 0.0 }
 0x468   :  { %2595 = vmatmul.f32.vlgmr.msrb.gmra.mxu2 %v2558_v55 }
 0x4eb   :  { %v2596_v52 = vpop.f32.mrf.mxu2 }
 0x4ec   :  { %v2597_v56 = vadd.f32 %v2845_v63, %v2596_v52 }
 0x4ee   :  { %2846 = vtanh.f32 %v2597_v56 }
 0x4f4   :  { %v2847_v27 = vpop.eup %2846 }
 0x4f5   :  { %v2600_v59 = vmul.f32 2.0, %v2847_v27 }
 0x4f7   :  { %2601 = vst [vmem:[#allocation2] sm:$0x3] %v2600_v59 }
 0x4f8   :  { %2612 = dma.vmem_to_hbm [thread:$0]  %s2608_s28, 32, %s2610_s14, [#allocation3]  }
 0x4f9   :  { %2897 = dma.done.wait [#allocation3], 32  }
 0x4fa   :  { %2898 = vsyncadd [#allocation3], 4294967264 }
 0x4fb   :  { %2617 = vsyncpa [#allocation3], 1 }

</bundles_post_ra>
